<compile_context>
chip_gen: v6e
topology: v6e:2x2x1
jax: 0.10.0
libtpu: 0.0.40
codegen_flags: <defaults>
</compile_context>

<pallas_src>
import functools

import numpy as np
import jax
import jax.numpy as jnp
from jax.experimental import pallas as pl
from jax.experimental.pallas import tpu as pltpu


NEG_SLOPE = 0.2


# ----------------------------------------------------------------------------
# Fused Pallas kernel: conv1 -> LeakyReLU -> conv2 -> LeakyReLU -> conv3 head
# ----------------------------------------------------------------------------
def _fused_kernel(p1_ref, msk_ref, w1_ref, b1_ref, sel_ref, w2_ref, b2_ref,
                  w3_ref, b3_ref, o_ref, *, batch, m1i, m2i, cmid, n_tap):
    # ---- layer 1: Conv2d(1, 64, 3, stride=2, pad=1) + LeakyReLU(0.2) ------
    # p1_raw gathered in the wrapper; zero-padding mask applied here (VPU).
    p1 = p1_ref[...] * msk_ref[...]                                 # (B*m1i, 9)
    h1 = jnp.dot(p1, w1_ref[...], preferred_element_type=jnp.float32)
    h1 = h1 + b1_ref[...]
    h1 = jnp.where(h1 >= 0.0, h1, NEG_SLOPE * h1)                   # (B*m1i, 64) f32
    h1 = h1.astype(jnp.bfloat16)                                    # bf16 MXU operands

    sel = sel_ref[...]                                              # (9*m2i, m1i) bf16
    w2 = w2_ref[...]                                                # (9*cmid, cmid) bf16
    b2 = b2_ref[...]                                                # (1, cmid) f32
    w3 = w3_ref[...]                                                # (m2i, cmid) f32

    col_sums = []
    for b in range(batch):                                          # static unroll (B=2)
        h1_b = h1[b * m1i:(b + 1) * m1i, :]                         # (m1i, cmid) bf16

        # ---- layer-2 im2col: ONE per-image 0/1 selection matmul ----------
        # win[t*m2i + m, c] = h1_b[row-for-tap-t-at-output-m, c] (0 for pad).
        win = jnp.dot(sel, h1_b,
                      preferred_element_type=jnp.float32).astype(jnp.bfloat16)

        # ---- layer 2: Conv2d(64, 64, 3, stride=2, pad=1) + LeakyReLU -----
        # 9 tap dots; 3 independent accumulators keep the MXU dep chain short.
        accs = [jnp.zeros((m2i, cmid), jnp.float32) for _ in range(3)]
        for t in range(n_tap):
            accs[t % 3] = accs[t % 3] + jnp.dot(
                win[t * m2i:(t + 1) * m2i, :],
                w2[t * cmid:(t + 1) * cmid, :],
                preferred_element_type=jnp.float32)
        h2 = accs[0] + accs[1] + accs[2] + b2
        h2 = jnp.where(h2 >= 0.0, h2, NEG_SLOPE * h2)               # (m2i, cmid) f32

        # ---- layer 3: Conv2d(64, 1, k3) over the whole 4x4 map -----------
        # N=1 head on the VPU/XLU: elementwise multiply + sublane reduce.
        col_sums.append(jnp.sum(h2 * w3, axis=0, keepdims=True))    # (1, cmid)

    cs = jnp.concatenate(col_sums, axis=0)                          # (B, cmid)
    o_ref[...] = jnp.sum(cs, axis=1, keepdims=True) + b3_ref[0]     # (B, 1)


# ----------------------------------------------------------------------------
# Trace-time geometry constants (numpy, cached per (batch, input_size))
# ----------------------------------------------------------------------------
@functools.lru_cache(maxsize=None)
def _build_constants(batch, input_size):
    h0 = input_size
    h1 = (h0 + 2 - 3) // 2 + 1          # conv1 output spatial (k3, s2, p1)
    h2 = (h1 + 2 - 3) // 2 + 1          # conv2 output spatial
    k3 = input_size // 4
    assert h2 == k3, "layer-3 kernel must cover the whole layer-2 map"

    m1 = batch * h1 * h1

    # Layer-1 im2col: flat gather indices into the raw input + padding mask.
    idx = np.zeros((m1, 9), np.int32)
    msk = np.zeros((m1, 9), np.float32)
    for b in range(batch):
        for ho in range(h1):
            for wo in range(h1):
                m = (b * h1 + ho) * h1 + wo
                for i in range(3):
                    for j in range(3):
                        r, s = 2 * ho + i - 1, 2 * wo + j - 1
                        if 0 <= r < h0 and 0 <= s < h0:
                            idx[m, i * 3 + j] = (b * h0 + r) * h0 + s
                            msk[m, i * 3 + j] = 1.0

    # Layer-2 im2col as a PER-IMAGE 0/1 row-selection matrix (batch-independent).
    sel = np.zeros((9 * h2 * h2, h1 * h1), np.float32)
    for ho in range(h2):
        for wo in range(h2):
            m = ho * h2 + wo
            for i in range(3):
                for j in range(3):
                    r, s = 2 * ho + i - 1, 2 * wo + j - 1
                    if 0 <= r < h1 and 0 <= s < h1:
                        sel[(i * 3 + j) * (h2 * h2) + m, r * h1 + s] = 1.0

    return {"idx": idx, "msk": msk, "sel": sel,
            "m1i": h1 * h1, "m2i": h2 * h2}


# ----------------------------------------------------------------------------
# One-time parameter preparation (hoisted out of the forward path)
# ----------------------------------------------------------------------------
def prepare_params(params):
    cmid = params["w1"].shape[0]                                    # 64
    kk = params["w3"].shape[-1]                                     # input_size // 4
    return {
        "w1m": jnp.asarray(params["w1"]).reshape(cmid, 9).T
                  .astype(jnp.float32),                             # (9, 64)
        "b1m": jnp.asarray(params["b1"]).reshape(1, cmid).astype(jnp.float32),
        "w2m": jnp.asarray(params["w2"]).transpose(2, 3, 1, 0)
                  .reshape(9 * cmid, cmid).astype(jnp.bfloat16),    # (576, 64) bf16
        "b2m": jnp.asarray(params["b2"]).reshape(1, cmid).astype(jnp.float32),
        "w3m": jnp.asarray(params["w3"]).transpose(0, 2, 3, 1)
                  .reshape(kk * kk, cmid).astype(jnp.float32),      # (16, 64)
        "b3s": jnp.asarray(params["b3"]).reshape(1).astype(jnp.float32),
    }


# ----------------------------------------------------------------------------
# Forward pass: one gather + one pallas_call
# ----------------------------------------------------------------------------
@jax.jit
def adversarial_d_forward(prepped, x):
    batch, cin, h0, w0 = x.shape
    assert cin == 1 and h0 == w0
    c = _build_constants(batch, h0)

    cmid = prepped["w1m"].shape[1]

    # The only non-Pallas op in the forward: layer-1 im2col gather of the raw
    # 2 KB input (the zero-padding mask is applied inside the kernel).
    # TODO(synk): fold this gather into the kernel once in-kernel VMEM gathers
    # lower reliably on all TPU generations; today it is one tiny fused XLA op.
    p1_raw = x.reshape(batch * h0 * w0)[jnp.asarray(c["idx"])]      # (B*m1i, 9)

    kernel = functools.partial(_fused_kernel, batch=batch, m1i=c["m1i"],
                               m2i=c["m2i"], cmid=cmid, n_tap=9)
    vmem = pl.BlockSpec(memory_space=pltpu.MemorySpace.VMEM)
    smem = pl.BlockSpec(memory_space=pltpu.MemorySpace.SMEM)
    out = pl.pallas_call(
        kernel,
        out_shape=jax.ShapeDtypeStruct((batch, 1), jnp.float32),
        in_specs=[vmem, vmem, vmem, vmem, vmem, vmem, vmem, vmem, smem],
        out_specs=vmem,
    )(p1_raw,
      jnp.asarray(c["msk"]),
      prepped["w1m"], prepped["b1m"],
      jnp.asarray(c["sel"]).astype(jnp.bfloat16),
      prepped["w2m"], prepped["b2m"],
      prepped["w3m"], prepped["b3s"])
    return out.reshape(-1)                                          # == outputs.view(-1)


# ----------------------------------------------------------------------------
# Parameter init (matches PyTorch Conv2d shapes, uniform +-1/sqrt(fan_in))
# ----------------------------------------------------------------------------
def init_params(key, input_size):
    ks = int(input_size // 4)
    keys = jax.random.split(key, 6)

    def u(k, shape, fan_in):
        bound = 1.0 / float(fan_in) ** 0.5
        return jax.random.uniform(k, shape, jnp.float32, -bound, bound)

    return {
        "w1": u(keys[0], (64, 1, 3, 3), 1 * 3 * 3),
        "b1": u(keys[1], (64,), 1 * 3 * 3),
        "w2": u(keys[2], (64, 64, 3, 3), 64 * 3 * 3),
        "b2": u(keys[3], (64,), 64 * 3 * 3),
        "w3": u(keys[4], (1, 64, ks, ks), 64 * ks * ks),
        "b3": u(keys[5], (1,), 64 * ks * ks),
    }


# ----------------------------------------------------------------------------
# Pure-JAX reference (numerical sanity check)
# ----------------------------------------------------------------------------
def _reference_forward(params, x):
    def conv(x, w, b, stride, pad):
        y = jax.lax.conv_general_dilated(
            x, w, window_strides=(stride, stride),
            padding=[(pad, pad), (pad, pad)],
            dimension_numbers=("NCHW", "OIHW", "NCHW"))
        return y + b.reshape(1, -1, 1, 1)

    h = conv(x, params["w1"], params["b1"], 2, 1)
    h = jnp.where(h >= 0, h, NEG_SLOPE * h)
    h = conv(h, params["w2"], params["b2"], 2, 1)
    h = jnp.where(h >= 0, h, NEG_SLOPE * h)
    h = conv(h, params["w3"], params["b3"], 1, 0)
    return h.reshape(-1)


if __name__ == "__main__":
    INPUT_SIZE = 16          # -> last conv kernel_size = 4
    BATCH = 2

    key = jax.random.PRNGKey(0)
    k_param, k_x = jax.random.split(key)
    params = init_params(k_param, INPUT_SIZE)
    prepped = prepare_params(params)                 # one-time weight reorder
    x = jax.random.normal(k_x, (BATCH, 1, INPUT_SIZE, INPUT_SIZE), jnp.float32)

    out = jax.block_until_ready(adversarial_d_forward(prepped, x))
    assert out.shape == (BATCH,), out.shape

    ref = jax.block_until_ready(_reference_forward(params, x))
    scale = float(jnp.max(jnp.abs(ref))) + 1e-6
    max_err = float(jnp.max(jnp.abs(out - ref)))
    assert max_err <= 5e-2 * scale + 1e-4, (max_err, scale)

    print("KERNEL_OK")
</pallas_src>

<mosaic_0001>
module attributes {stable_mosaic.version = 11 : i64} {
  func.func @_fused_kernel(%arg0: memref<128x9xf32, #tpu.memory_space<vmem>>, %arg1: memref<128x9xf32, #tpu.memory_space<vmem>>, %arg2: memref<9x64xf32, #tpu.memory_space<vmem>>, %arg3: memref<1x64xf32, #tpu.memory_space<vmem>>, %arg4: memref<144x64xbf16, #tpu.memory_space<vmem>>, %arg5: memref<576x64xbf16, #tpu.memory_space<vmem>>, %arg6: memref<1x64xf32, #tpu.memory_space<vmem>>, %arg7: memref<16x64xf32, #tpu.memory_space<vmem>>, %arg8: memref<1xf32, #tpu.memory_space<smem>>, %arg9: memref<2x1xf32, #tpu.memory_space<vmem>>) attributes {dimension_semantics = [], scalar_prefetch = 0 : i64, scratch_operands = 0 : i64, tpu.core_type = #tpu.core_type<tc>} {
    %c0 = arith.constant 0 : index
    %c0_0 = arith.constant 0 : index
    %0 = vector.load %arg0[%c0, %c0_0] : memref<128x9xf32, #tpu.memory_space<vmem>>, vector<128x9xf32>
    %c0_1 = arith.constant 0 : index
    %c0_2 = arith.constant 0 : index
    %1 = vector.load %arg1[%c0_1, %c0_2] : memref<128x9xf32, #tpu.memory_space<vmem>>, vector<128x9xf32>
    %2 = arith.mulf %0, %1 : vector<128x9xf32>
    %c0_3 = arith.constant 0 : index
    %c0_4 = arith.constant 0 : index
    %3 = vector.load %arg2[%c0_3, %c0_4] : memref<9x64xf32, #tpu.memory_space<vmem>>, vector<9x64xf32>
    %cst = arith.constant dense<0.000000e+00> : vector<128x64xf32>
    %4 = tpu.matmul %2, %3, %cst {dimension_numbers = #tpu.dot_dimension_numbers<[1], [0], [0], [1], [0, 0, 1, 1], [], []>} : vector<128x9xf32>, vector<9x64xf32>, vector<128x64xf32> -> vector<128x64xf32>
    %c0_5 = arith.constant 0 : index
    %c0_6 = arith.constant 0 : index
    %5 = vector.load %arg3[%c0_5, %c0_6] : memref<1x64xf32, #tpu.memory_space<vmem>>, vector<1x64xf32>
    %6 = vector.broadcast %5 : vector<1x64xf32> to vector<128x64xf32>
    %7 = arith.addf %4, %6 : vector<128x64xf32>
    %cst_7 = arith.constant 0.000000e+00 : f32
    %8 = vector.broadcast %cst_7 : f32 to vector<128x64xf32>
    %9 = arith.cmpf oge, %7, %8 : vector<128x64xf32>
    %cst_8 = arith.constant 2.000000e-01 : f32
    %10 = vector.broadcast %cst_8 : f32 to vector<128x64xf32>
    %11 = arith.mulf %10, %7 : vector<128x64xf32>
    %12 = arith.select %9, %7, %11 : vector<128x64xi1>, vector<128x64xf32>
    %13 = arith.truncf %12 : vector<128x64xf32> to vector<128x64xbf16>
    %c0_9 = arith.constant 0 : index
    %c0_10 = arith.constant 0 : index
    %14 = vector.load %arg4[%c0_9, %c0_10] : memref<144x64xbf16, #tpu.memory_space<vmem>>, vector<144x64xbf16>
    %c0_11 = arith.constant 0 : index
    %c0_12 = arith.constant 0 : index
    %15 = vector.load %arg5[%c0_11, %c0_12] : memref<576x64xbf16, #tpu.memory_space<vmem>>, vector<576x64xbf16>
    %c0_13 = arith.constant 0 : index
    %c0_14 = arith.constant 0 : index
    %16 = vector.load %arg6[%c0_13, %c0_14] : memref<1x64xf32, #tpu.memory_space<vmem>>, vector<1x64xf32>
    %c0_15 = arith.constant 0 : index
    %c0_16 = arith.constant 0 : index
    %17 = vector.load %arg7[%c0_15, %c0_16] : memref<16x64xf32, #tpu.memory_space<vmem>>, vector<16x64xf32>
    %18 = vector.extract_strided_slice %13 {offsets = [0, 0], sizes = [64, 64], strides = [1, 1]} : vector<128x64xbf16> to vector<64x64xbf16>
    %cst_17 = arith.constant dense<0.000000e+00> : vector<144x64xf32>
    %19 = tpu.matmul %14, %18, %cst_17 {dimension_numbers = #tpu.dot_dimension_numbers<[1], [0], [0], [1], [0, 0, 1, 1], [], []>} : vector<144x64xbf16>, vector<64x64xbf16>, vector<144x64xf32> -> vector<144x64xf32>
    %20 = arith.truncf %19 : vector<144x64xf32> to vector<144x64xbf16>
    %cst_18 = arith.constant 0.000000e+00 : f32
    %21 = vector.broadcast %cst_18 : f32 to vector<16x64xf32>
    %cst_19 = arith.constant 0.000000e+00 : f32
    %22 = vector.broadcast %cst_19 : f32 to vector<16x64xf32>
    %cst_20 = arith.constant 0.000000e+00 : f32
    %23 = vector.broadcast %cst_20 : f32 to vector<16x64xf32>
    %24 = vector.extract_strided_slice %20 {offsets = [0, 0], sizes = [16, 64], strides = [1, 1]} : vector<144x64xbf16> to vector<16x64xbf16>
    %25 = vector.extract_strided_slice %15 {offsets = [0, 0], sizes = [64, 64], strides = [1, 1]} : vector<576x64xbf16> to vector<64x64xbf16>
    %cst_21 = arith.constant dense<0.000000e+00> : vector<16x64xf32>
    %26 = tpu.matmul %24, %25, %cst_21 {dimension_numbers = #tpu.dot_dimension_numbers<[1], [0], [0], [1], [0, 0, 1, 1], [], []>} : vector<16x64xbf16>, vector<64x64xbf16>, vector<16x64xf32> -> vector<16x64xf32>
    %27 = arith.addf %21, %26 : vector<16x64xf32>
    %28 = vector.extract_strided_slice %20 {offsets = [16, 0], sizes = [16, 64], strides = [1, 1]} : vector<144x64xbf16> to vector<16x64xbf16>
    %29 = vector.extract_strided_slice %15 {offsets = [64, 0], sizes = [64, 64], strides = [1, 1]} : vector<576x64xbf16> to vector<64x64xbf16>
    %cst_22 = arith.constant dense<0.000000e+00> : vector<16x64xf32>
    %30 = tpu.matmul %28, %29, %cst_22 {dimension_numbers = #tpu.dot_dimension_numbers<[1], [0], [0], [1], [0, 0, 1, 1], [], []>} : vector<16x64xbf16>, vector<64x64xbf16>, vector<16x64xf32> -> vector<16x64xf32>
    %31 = arith.addf %22, %30 : vector<16x64xf32>
    %32 = vector.extract_strided_slice %20 {offsets = [32, 0], sizes = [16, 64], strides = [1, 1]} : vector<144x64xbf16> to vector<16x64xbf16>
    %33 = vector.extract_strided_slice %15 {offsets = [128, 0], sizes = [64, 64], strides = [1, 1]} : vector<576x64xbf16> to vector<64x64xbf16>
    %cst_23 = arith.constant dense<0.000000e+00> : vector<16x64xf32>
    %34 = tpu.matmul %32, %33, %cst_23 {dimension_numbers = #tpu.dot_dimension_numbers<[1], [0], [0], [1], [0, 0, 1, 1], [], []>} : vector<16x64xbf16>, vector<64x64xbf16>, vector<16x64xf32> -> vector<16x64xf32>
    %35 = arith.addf %23, %34 : vector<16x64xf32>
    %36 = vector.extract_strided_slice %20 {offsets = [48, 0], sizes = [16, 64], strides = [1, 1]} : vector<144x64xbf16> to vector<16x64xbf16>
    %37 = vector.extract_strided_slice %15 {offsets = [192, 0], sizes = [64, 64], strides = [1, 1]} : vector<576x64xbf16> to vector<64x64xbf16>
    %cst_24 = arith.constant dense<0.000000e+00> : vector<16x64xf32>
    %38 = tpu.matmul %36, %37, %cst_24 {dimension_numbers = #tpu.dot_dimension_numbers<[1], [0], [0], [1], [0, 0, 1, 1], [], []>} : vector<16x64xbf16>, vector<64x64xbf16>, vector<16x64xf32> -> vector<16x64xf32>
    %39 = arith.addf %27, %38 : vector<16x64xf32>
    %40 = vector.extract_strided_slice %20 {offsets = [64, 0], sizes = [16, 64], strides = [1, 1]} : vector<144x64xbf16> to vector<16x64xbf16>
    %41 = vector.extract_strided_slice %15 {offsets = [256, 0], sizes = [64, 64], strides = [1, 1]} : vector<576x64xbf16> to vector<64x64xbf16>
    %cst_25 = arith.constant dense<0.000000e+00> : vector<16x64xf32>
    %42 = tpu.matmul %40, %41, %cst_25 {dimension_numbers = #tpu.dot_dimension_numbers<[1], [0], [0], [1], [0, 0, 1, 1], [], []>} : vector<16x64xbf16>, vector<64x64xbf16>, vector<16x64xf32> -> vector<16x64xf32>
    %43 = arith.addf %31, %42 : vector<16x64xf32>
    %44 = vector.extract_strided_slice %20 {offsets = [80, 0], sizes = [16, 64], strides = [1, 1]} : vector<144x64xbf16> to vector<16x64xbf16>
    %45 = vector.extract_strided_slice %15 {offsets = [320, 0], sizes = [64, 64], strides = [1, 1]} : vector<576x64xbf16> to vector<64x64xbf16>
    %cst_26 = arith.constant dense<0.000000e+00> : vector<16x64xf32>
    %46 = tpu.matmul %44, %45, %cst_26 {dimension_numbers = #tpu.dot_dimension_numbers<[1], [0], [0], [1], [0, 0, 1, 1], [], []>} : vector<16x64xbf16>, vector<64x64xbf16>, vector<16x64xf32> -> vector<16x64xf32>
    %47 = arith.addf %35, %46 : vector<16x64xf32>
    %48 = vector.extract_strided_slice %20 {offsets = [96, 0], sizes = [16, 64], strides = [1, 1]} : vector<144x64xbf16> to vector<16x64xbf16>
    %49 = vector.extract_strided_slice %15 {offsets = [384, 0], sizes = [64, 64], strides = [1, 1]} : vector<576x64xbf16> to vector<64x64xbf16>
    %cst_27 = arith.constant dense<0.000000e+00> : vector<16x64xf32>
    %50 = tpu.matmul %48, %49, %cst_27 {dimension_numbers = #tpu.dot_dimension_numbers<[1], [0], [0], [1], [0, 0, 1, 1], [], []>} : vector<16x64xbf16>, vector<64x64xbf16>, vector<16x64xf32> -> vector<16x64xf32>
    %51 = arith.addf %39, %50 : vector<16x64xf32>
    %52 = vector.extract_strided_slice %20 {offsets = [112, 0], sizes = [16, 64], strides = [1, 1]} : vector<144x64xbf16> to vector<16x64xbf16>
    %53 = vector.extract_strided_slice %15 {offsets = [448, 0], sizes = [64, 64], strides = [1, 1]} : vector<576x64xbf16> to vector<64x64xbf16>
    %cst_28 = arith.constant dense<0.000000e+00> : vector<16x64xf32>
    %54 = tpu.matmul %52, %53, %cst_28 {dimension_numbers = #tpu.dot_dimension_numbers<[1], [0], [0], [1], [0, 0, 1, 1], [], []>} : vector<16x64xbf16>, vector<64x64xbf16>, vector<16x64xf32> -> vector<16x64xf32>
    %55 = arith.addf %43, %54 : vector<16x64xf32>
    %56 = vector.extract_strided_slice %20 {offsets = [128, 0], sizes = [16, 64], strides = [1, 1]} : vector<144x64xbf16> to vector<16x64xbf16>
    %57 = vector.extract_strided_slice %15 {offsets = [512, 0], sizes = [64, 64], strides = [1, 1]} : vector<576x64xbf16> to vector<64x64xbf16>
    %cst_29 = arith.constant dense<0.000000e+00> : vector<16x64xf32>
    %58 = tpu.matmul %56, %57, %cst_29 {dimension_numbers = #tpu.dot_dimension_numbers<[1], [0], [0], [1], [0, 0, 1, 1], [], []>} : vector<16x64xbf16>, vector<64x64xbf16>, vector<16x64xf32> -> vector<16x64xf32>
    %59 = arith.addf %47, %58 : vector<16x64xf32>
    %60 = arith.addf %51, %55 : vector<16x64xf32>
    %61 = arith.addf %60, %59 : vector<16x64xf32>
    %62 = vector.broadcast %16 : vector<1x64xf32> to vector<16x64xf32>
    %63 = arith.addf %61, %62 : vector<16x64xf32>
    %cst_30 = arith.constant 0.000000e+00 : f32
    %64 = vector.broadcast %cst_30 : f32 to vector<16x64xf32>
    %65 = arith.cmpf oge, %63, %64 : vector<16x64xf32>
    %cst_31 = arith.constant 2.000000e-01 : f32
    %66 = vector.broadcast %cst_31 : f32 to vector<16x64xf32>
    %67 = arith.mulf %66, %63 : vector<16x64xf32>
    %68 = arith.select %65, %63, %67 : vector<16x64xi1>, vector<16x64xf32>
    %69 = arith.mulf %68, %17 : vector<16x64xf32>
    %cst_32 = arith.constant dense<0.000000e+00> : vector<64xf32>
    %70 = vector.multi_reduction <add>, %69, %cst_32 [0] : vector<16x64xf32> to vector<64xf32>
    %71 = vector.shape_cast %70 : vector<64xf32> to vector<1x64xf32>
    %72 = vector.extract_strided_slice %13 {offsets = [64, 0], sizes = [64, 64], strides = [1, 1]} : vector<128x64xbf16> to vector<64x64xbf16>
    %cst_33 = arith.constant dense<0.000000e+00> : vector<144x64xf32>
    %73 = tpu.matmul %14, %72, %cst_33 {dimension_numbers = #tpu.dot_dimension_numbers<[1], [0], [0], [1], [0, 0, 1, 1], [], []>} : vector<144x64xbf16>, vector<64x64xbf16>, vector<144x64xf32> -> vector<144x64xf32>
    %74 = arith.truncf %73 : vector<144x64xf32> to vector<144x64xbf16>
    %cst_34 = arith.constant 0.000000e+00 : f32
    %75 = vector.broadcast %cst_34 : f32 to vector<16x64xf32>
    %cst_35 = arith.constant 0.000000e+00 : f32
    %76 = vector.broadcast %cst_35 : f32 to vector<16x64xf32>
    %cst_36 = arith.constant 0.000000e+00 : f32
    %77 = vector.broadcast %cst_36 : f32 to vector<16x64xf32>
    %78 = vector.extract_strided_slice %74 {offsets = [0, 0], sizes = [16, 64], strides = [1, 1]} : vector<144x64xbf16> to vector<16x64xbf16>
    %79 = vector.extract_strided_slice %15 {offsets = [0, 0], sizes = [64, 64], strides = [1, 1]} : vector<576x64xbf16> to vector<64x64xbf16>
    %cst_37 = arith.constant dense<0.000000e+00> : vector<16x64xf32>
    %80 = tpu.matmul %78, %79, %cst_37 {dimension_numbers = #tpu.dot_dimension_numbers<[1], [0], [0], [1], [0, 0, 1, 1], [], []>} : vector<16x64xbf16>, vector<64x64xbf16>, vector<16x64xf32> -> vector<16x64xf32>
    %81 = arith.addf %75, %80 : vector<16x64xf32>
    %82 = vector.extract_strided_slice %74 {offsets = [16, 0], sizes = [16, 64], strides = [1, 1]} : vector<144x64xbf16> to vector<16x64xbf16>
    %83 = vector.extract_strided_slice %15 {offsets = [64, 0], sizes = [64, 64], strides = [1, 1]} : vector<576x64xbf16> to vector<64x64xbf16>
    %cst_38 = arith.constant dense<0.000000e+00> : vector<16x64xf32>
    %84 = tpu.matmul %82, %83, %cst_38 {dimension_numbers = #tpu.dot_dimension_numbers<[1], [0], [0], [1], [0, 0, 1, 1], [], []>} : vector<16x64xbf16>, vector<64x64xbf16>, vector<16x64xf32> -> vector<16x64xf32>
    %85 = arith.addf %76, %84 : vector<16x64xf32>
    %86 = vector.extract_strided_slice %74 {offsets = [32, 0], sizes = [16, 64], strides = [1, 1]} : vector<144x64xbf16> to vector<16x64xbf16>
    %87 = vector.extract_strided_slice %15 {offsets = [128, 0], sizes = [64, 64], strides = [1, 1]} : vector<576x64xbf16> to vector<64x64xbf16>
    %cst_39 = arith.constant dense<0.000000e+00> : vector<16x64xf32>
    %88 = tpu.matmul %86, %87, %cst_39 {dimension_numbers = #tpu.dot_dimension_numbers<[1], [0], [0], [1], [0, 0, 1, 1], [], []>} : vector<16x64xbf16>, vector<64x64xbf16>, vector<16x64xf32> -> vector<16x64xf32>
    %89 = arith.addf %77, %88 : vector<16x64xf32>
    %90 = vector.extract_strided_slice %74 {offsets = [48, 0], sizes = [16, 64], strides = [1, 1]} : vector<144x64xbf16> to vector<16x64xbf16>
    %91 = vector.extract_strided_slice %15 {offsets = [192, 0], sizes = [64, 64], strides = [1, 1]} : vector<576x64xbf16> to vector<64x64xbf16>
    %cst_40 = arith.constant dense<0.000000e+00> : vector<16x64xf32>
    %92 = tpu.matmul %90, %91, %cst_40 {dimension_numbers = #tpu.dot_dimension_numbers<[1], [0], [0], [1], [0, 0, 1, 1], [], []>} : vector<16x64xbf16>, vector<64x64xbf16>, vector<16x64xf32> -> vector<16x64xf32>
    %93 = arith.addf %81, %92 : vector<16x64xf32>
    %94 = vector.extract_strided_slice %74 {offsets = [64, 0], sizes = [16, 64], strides = [1, 1]} : vector<144x64xbf16> to vector<16x64xbf16>
    %95 = vector.extract_strided_slice %15 {offsets = [256, 0], sizes = [64, 64], strides = [1, 1]} : vector<576x64xbf16> to vector<64x64xbf16>
    %cst_41 = arith.constant dense<0.000000e+00> : vector<16x64xf32>
    %96 = tpu.matmul %94, %95, %cst_41 {dimension_numbers = #tpu.dot_dimension_numbers<[1], [0], [0], [1], [0, 0, 1, 1], [], []>} : vector<16x64xbf16>, vector<64x64xbf16>, vector<16x64xf32> -> vector<16x64xf32>
    %97 = arith.addf %85, %96 : vector<16x64xf32>
    %98 = vector.extract_strided_slice %74 {offsets = [80, 0], sizes = [16, 64], strides = [1, 1]} : vector<144x64xbf16> to vector<16x64xbf16>
    %99 = vector.extract_strided_slice %15 {offsets = [320, 0], sizes = [64, 64], strides = [1, 1]} : vector<576x64xbf16> to vector<64x64xbf16>
    %cst_42 = arith.constant dense<0.000000e+00> : vector<16x64xf32>
    %100 = tpu.matmul %98, %99, %cst_42 {dimension_numbers = #tpu.dot_dimension_numbers<[1], [0], [0], [1], [0, 0, 1, 1], [], []>} : vector<16x64xbf16>, vector<64x64xbf16>, vector<16x64xf32> -> vector<16x64xf32>
    %101 = arith.addf %89, %100 : vector<16x64xf32>
    %102 = vector.extract_strided_slice %74 {offsets = [96, 0], sizes = [16, 64], strides = [1, 1]} : vector<144x64xbf16> to vector<16x64xbf16>
    %103 = vector.extract_strided_slice %15 {offsets = [384, 0], sizes = [64, 64], strides = [1, 1]} : vector<576x64xbf16> to vector<64x64xbf16>
    %cst_43 = arith.constant dense<0.000000e+00> : vector<16x64xf32>
    %104 = tpu.matmul %102, %103, %cst_43 {dimension_numbers = #tpu.dot_dimension_numbers<[1], [0], [0], [1], [0, 0, 1, 1], [], []>} : vector<16x64xbf16>, vector<64x64xbf16>, vector<16x64xf32> -> vector<16x64xf32>
    %105 = arith.addf %93, %104 : vector<16x64xf32>
    %106 = vector.extract_strided_slice %74 {offsets = [112, 0], sizes = [16, 64], strides = [1, 1]} : vector<144x64xbf16> to vector<16x64xbf16>
    %107 = vector.extract_strided_slice %15 {offsets = [448, 0], sizes = [64, 64], strides = [1, 1]} : vector<576x64xbf16> to vector<64x64xbf16>
    %cst_44 = arith.constant dense<0.000000e+00> : vector<16x64xf32>
    %108 = tpu.matmul %106, %107, %cst_44 {dimension_numbers = #tpu.dot_dimension_numbers<[1], [0], [0], [1], [0, 0, 1, 1], [], []>} : vector<16x64xbf16>, vector<64x64xbf16>, vector<16x64xf32> -> vector<16x64xf32>
    %109 = arith.addf %97, %108 : vector<16x64xf32>
    %110 = vector.extract_strided_slice %74 {offsets = [128, 0], sizes = [16, 64], strides = [1, 1]} : vector<144x64xbf16> to vector<16x64xbf16>
    %111 = vector.extract_strided_slice %15 {offsets = [512, 0], sizes = [64, 64], strides = [1, 1]} : vector<576x64xbf16> to vector<64x64xbf16>
    %cst_45 = arith.constant dense<0.000000e+00> : vector<16x64xf32>
    %112 = tpu.matmul %110, %111, %cst_45 {dimension_numbers = #tpu.dot_dimension_numbers<[1], [0], [0], [1], [0, 0, 1, 1], [], []>} : vector<16x64xbf16>, vector<64x64xbf16>, vector<16x64xf32> -> vector<16x64xf32>
    %113 = arith.addf %101, %112 : vector<16x64xf32>
    %114 = arith.addf %105, %109 : vector<16x64xf32>
    %115 = arith.addf %114, %113 : vector<16x64xf32>
    %116 = vector.broadcast %16 : vector<1x64xf32> to vector<16x64xf32>
    %117 = arith.addf %115, %116 : vector<16x64xf32>
    %cst_46 = arith.constant 0.000000e+00 : f32
    %118 = vector.broadcast %cst_46 : f32 to vector<16x64xf32>
    %119 = arith.cmpf oge, %117, %118 : vector<16x64xf32>
    %cst_47 = arith.constant 2.000000e-01 : f32
    %120 = vector.broadcast %cst_47 : f32 to vector<16x64xf32>
    %121 = arith.mulf %120, %117 : vector<16x64xf32>
    %122 = arith.select %119, %117, %121 : vector<16x64xi1>, vector<16x64xf32>
    %123 = arith.mulf %122, %17 : vector<16x64xf32>
    %cst_48 = arith.constant dense<0.000000e+00> : vector<64xf32>
    %124 = vector.multi_reduction <add>, %123, %cst_48 [0] : vector<16x64xf32> to vector<64xf32>
    %125 = vector.shape_cast %124 : vector<64xf32> to vector<1x64xf32>
    %126 = tpu.concatenate %71, %125 in 0 : vector<1x64xf32>, vector<1x64xf32> -> vector<2x64xf32>
    %cst_49 = arith.constant dense<0.000000e+00> : vector<2xf32>
    %127 = vector.multi_reduction <add>, %126, %cst_49 [1] : vector<2x64xf32> to vector<2xf32>
    %128 = vector.shape_cast %127 : vector<2xf32> to vector<2x1xf32>
    %c0_50 = arith.constant 0 : index
    %129 = memref.load %arg8[%c0_50] : memref<1xf32, #tpu.memory_space<smem>>
    %130 = vector.broadcast %129 : f32 to vector<2x1xf32>
    %131 = arith.addf %128, %130 : vector<2x1xf32>
    %c0_51 = arith.constant 0 : index
    %c0_52 = arith.constant 0 : index
    %132 = vector.load %arg9[%c0_51, %c0_52] : memref<2x1xf32, #tpu.memory_space<vmem>>, vector<2x1xf32>
    tpu.vector_store %arg9[%c0_51, %c0_52], %131 {strides = array<i32>} : memref<2x1xf32, #tpu.memory_space<vmem>>, vector<2x1xf32>,
    return
  }
}

</mosaic_0001>

<bundles_post_ra>
// kernel: adversarial_d_forward.1
= control target key start
LH: loop header
LB: loop body
LE: loop exit
PB: predicated region body
PF: predicated region fallthrough
CT: control target
= control target key end

     0   :  { %vm140_vm0 = vcmask 1040384   ;;  %vm91_vm1 = vcmask 72704   ;;  %v2438_v26 = vmov 0.0   ;;  %vm2439_vm2 = vmmov 0   ;;  %s3211_s2 = inlined_call_operand.vmem [shape: f32[9,64], index: 2, kind: input, shape index: {}]   ;;  %s3212_s0 = inlined_call_operand.vmem [shape: f32[128,9], index: 0, kind: input, shape index: {}]   ;;  %s3213_s1 = inlined_call_operand.vmem [shape: f32[128,9], index: 1, kind: input, shape index: {}]   ;;  %s3214_s4 = inlined_call_operand.vmem [shape: bf16[144,64], index: 4, kind: input, shape index: {}]   ;;  %s3215_s5 = inlined_call_operand.vmem [shape: bf16[576,64], index: 5, kind: input, shape index: {}]   ;;  %s3216_s3 = inlined_call_operand.vmem [shape: f32[1,64], index: 3, kind: input, shape index: {}]   ;;  %s3217_s6 = inlined_call_operand.vmem [shape: f32[1,64], index: 6, kind: input, shape index: {}]   ;;  %s3218_s7 = inlined_call_operand.vmem [shape: f32[16,64], index: 7, kind: input, shape index: {}]   ;;  %s3219_s8 = inlined_call_operand.<no memory space> [shape: f32[1], index: 8, kind: input, shape index: {}]   ;;  %s3220_s9 = inlined_call_operand.vmem [shape: f32[2,1], index: 9, kind: output, shape index: {}]  }
   0x1   :  { %v83_v0 = vld [vmem:[%s3211_s2 + $0x8] sm:$0x1]  ;;  %v82_v1 = vld [vmem:[%s3211_s2] sm:$0xff]  ;;  %v36_v8 = vld [vmem:[%s3212_s0 + $0x10] sm:$0xff]  ;;  %2087 = vmatprep.subr.bf16.mxu1 %v2438_v26  ;;  %2095 = vmatprep.mubr.msk.bf16.mxu1 %vm2439_vm2, %v2438_v26  ;;  %vm483_vm11 = vcmask 523264  }
   0x2   :  { %v34_v2 = vld [vmem:[%s3212_s0] sm:$0xff]  ;;  %2059 = vmatprep.subr.msk.mxu0 %vm140_vm0, %v83_v0  ;;  %v35_v4 = vld [vmem:[%s3212_s0 + $0x8] sm:$0xff]  ;;  %v52_v9 = vld [vmem:[%s3213_s1 + $0x10] sm:$0xff] }
   0x3   :  { %v50_v3 = vld [vmem:[%s3213_s1] sm:$0xff]  ;;  %v51_v5 = vld [vmem:[%s3213_s1 + $0x8] sm:$0xff]  ;;  %2060 = vmatpush3.msk.msra.mxu0 %vm140_vm0, %v83_v0  ;;  %v37_v10 = vld [vmem:[%s3212_s0 + $0x18] sm:$0xff]  ;;  %v68_v11 = vmul.f32 %v52_v9, %v36_v8 }
   0x4   :  { %v66_v6 = vmul.f32 %v50_v3, %v34_v2  ;;  %v67_v7 = vmul.f32 %v51_v5, %v35_v4  ;;  %2061 = vmatprep.subr.mxu0 %v82_v1  ;;  %v53_v12 = vld [vmem:[%s3213_s1 + $0x18] sm:$0xff]  ;;  %v38_v13 = vld [vmem:[%s3212_s0 + $0x20] sm:$0xff]  ;;  %v39_v17 = vld [vmem:[%s3212_s0 + $0x28] sm:$0xff] }
   0x5   :  { %v54_v14 = vld [vmem:[%s3213_s1 + $0x20] sm:$0xff]  ;;  %2062 = vmatpush3.msra.mxu0 %v82_v1  ;;  %v69_v15 = vmul.f32 %v53_v12, %v37_v10  ;;  %v55_v18 = vld [vmem:[%s3213_s1 + $0x28] sm:$0xff]  ;;  %v40_v19 = vld [vmem:[%s3212_s0 + $0x30] sm:$0xff] }
   0x6   :  { %2063 = vmatprep.mubr.msk.f32.mxu0 %vm91_vm1, %v66_v6  ;;  %v70_v16 = vmul.f32 %v54_v14, %v38_v13  ;;  %v56_v20 = vld [vmem:[%s3213_s1 + $0x30] sm:$0xff]  ;;  %v71_v21 = vmul.f32 %v55_v18, %v39_v17  ;;  %v41_v23 = vld [vmem:[%s3212_s0 + $0x38] sm:$0xff]  ;;  %2131 = vmatprep.subr.bf16.mxu0 %v2438_v26  ;;  %v42_v27 = vld [vmem:[%s3212_s0 + $0x40] sm:$0xff] }
   0x7   :  { %2064 = vmatmul.mubr.msk.f32.vlgmr.msra.gmra.mxu0 %vm91_vm1, %v67_v7  ;;  %v72_v22 = vmul.f32 %v56_v20, %v40_v19  ;;  %v57_v24 = vld [vmem:[%s3213_s1 + $0x38] sm:$0xff]  ;;  %v58_v28 = vld [vmem:[%s3213_s1 + $0x40] sm:$0xff]  ;;  %v43_v29 = vld [vmem:[%s3212_s0 + $0x48] sm:$0xff] }
   0x8   :  { %2066 = vmatprep.mubr.msk.f32.mxu0 %vm91_vm1, %v68_v11  ;;  %v73_v25 = vmul.f32 %v57_v24, %v41_v23  ;;  %v74_v30 = vmul.f32 %v58_v28, %v42_v27  ;;  %v59_v31 = vld [vmem:[%s3213_s1 + $0x48] sm:$0xff]  ;;  %v44_v32 = vld [vmem:[%s3212_s0 + $0x50] sm:$0xff]  ;;  %v45_v36 = vld [vmem:[%s3212_s0 + $0x58] sm:$0xff] }
   0x9   :  { %v60_v33 = vld [vmem:[%s3213_s1 + $0x50] sm:$0xff]  ;;  %v75_v34 = vmul.f32 %v59_v31, %v43_v29  ;;  %v61_v37 = vld [vmem:[%s3213_s1 + $0x58] sm:$0xff]  ;;  %v46_v39 = vld [vmem:[%s3212_s0 + $0x60] sm:$0xff] }
   0xa   :  { %v76_v35 = vmul.f32 %v60_v33, %v44_v32  ;;  %v77_v38 = vmul.f32 %v61_v37, %v45_v36  ;;  %v62_v40 = vld [vmem:[%s3213_s1 + $0x60] sm:$0xff]  ;;  %v47_v41 = vld [vmem:[%s3212_s0 + $0x68] sm:$0xff]  ;;  %v48_v44 = vld [vmem:[%s3212_s0 + $0x70] sm:$0xff] }
   0xb   :  { %2067 = vmatmul.mubr.msk.f32.gmra.mxu0 %vm91_vm1, %v69_v15  ;;  %v78_v42 = vmul.f32 %v62_v40, %v46_v39  ;;  %v63_v43 = vld [vmem:[%s3213_s1 + $0x68] sm:$0xff]  ;;  %v64_v45 = vld [vmem:[%s3213_s1 + $0x70] sm:$0xff]  ;;  %v49_v48 = vld [vmem:[%s3212_s0 + $0x78] sm:$0xff] }
   0xc   :  { %2069 = vmatprep.mubr.msk.f32.mxu0 %vm91_vm1, %v70_v16  ;;  %v79_v46 = vmul.f32 %v63_v43, %v47_v41  ;;  %v80_v47 = vmul.f32 %v64_v45, %v48_v44  ;;  %v65_v49 = vld [vmem:[%s3213_s1 + $0x78] sm:$0xff]  ;;  %v2626_v58 = vld [vmem:[%s3216_s3] ss:$0 sm:$0xff]  ;;  %v2652_v27 = vld [vmem:[%s3214_s4 + $0x8] sm:$0xff]  }
   0xd   :  { %v2614_v50 = vld [vmem:[%s3215_s5 + $0x78] sm:$0xff]   ;;  %v81_v51 = vmul.f32 %v65_v49, %v49_v48  ;;  %v2661_v28 = vld [vmem:[%s3214_s4 + $0x10] sm:$0xff]   ;;  %v2688_v31 = vld [vmem:[%s3214_s4 + $0x28] sm:$0xff]  }
   0xe   :  { %2132 = vmatpush3.bf16.msra.mxu0 %v2614_v50  ;;  %v2670_v29 = vld [vmem:[%s3214_s4 + $0x18] sm:$0xff]   ;;  %v2697_v32 = vld [vmem:[%s3214_s4 + $0x30] sm:$0xff]   ;;  %v2731_v36 = vld [vmem:[%s3215_s5 + $0x68] sm:$0xff]  }
   0xf   :  { %2070 = vmatmul.mubr.msk.f32.gmra.mxu0 %vm91_vm1, %v71_v21  ;;  %2133 = vmatprep.subr.bf16.mxu0 %v2438_v26  ;;  %v2706_v33 = vld [vmem:[%s3214_s4 + $0x38] sm:$0xff]   ;;  %v2738_v37 = vld [vmem:[%s3215_s5 + $0x60] sm:$0xff]   ;;  %v2752_v39 = vld [vmem:[%s3215_s5 + $0xb0] sm:$0xff]  }
  0x10   :  { %2072 = vmatprep.mubr.msk.f32.mxu0 %vm91_vm1, %v72_v22  ;;  %v2759_v40 = vld [vmem:[%s3215_s5 + $0xa8] sm:$0xff]   ;;  %v2766_v41 = vld [vmem:[%s3215_s5 + $0xa0] sm:$0xff]  }
  0x13   :  { %2073 = vmatmul.mubr.msk.f32.gmra.mxu0 %vm91_vm1, %v73_v25  ;;  %v2642_v25 = vld [vmem:[%s3214_s4] sm:$0xff]  }
  0x14   :  { %2075 = vmatprep.mubr.msk.f32.mxu0 %vm91_vm1, %v74_v30  ;;  %v2679_v30 = vld [vmem:[%s3214_s4 + $0x20] sm:$0xff]  }
  0x17   :  { %2076 = vmatmul.mubr.msk.f32.gmra.mxu0 %vm91_vm1, %v75_v34  ;;  %v2715_v34 = vld [vmem:[%s3214_s4 + $0x40] sm:$0xff]  }
  0x18   :  { %2078 = vmatprep.mubr.msk.f32.mxu0 %vm91_vm1, %v76_v35  ;;  %v2724_v35 = vld [vmem:[%s3215_s5 + $0x70] sm:$0xff]  }
  0x19   :  { %2134 = vmatpush3.bf16.msra.mxu0 %v2724_v35 }
  0x1a   :  { %2135 = vmatprep.subr.bf16.mxu0 %v2438_v26 }
  0x1b   :  { %2079 = vmatmul.mubr.msk.f32.gmra.mxu0 %vm91_vm1, %v77_v38  ;;  %v2745_v38 = vld [vmem:[%s3215_s5 + $0xb8] sm:$0xff]  }
  0x1c   :  { %2081 = vmatprep.mubr.msk.f32.mxu0 %vm91_vm1, %v78_v42 }
  0x1d   :  { %2136 = vmatpush3.bf16.msra.mxu0 %v2731_v36 }
  0x1e   :  { %2137 = vmatprep.subr.bf16.mxu0 %v2438_v26 }
  0x1f   :  { %2082 = vmatmul.mubr.msk.f32.gmra.mxu0 %vm91_vm1, %v79_v46 }
  0x20   :  { %2084 = vmatprep.mubr.msk.f32.mxu0 %vm91_vm1, %v80_v47 }
  0x21   :  { %2138 = vmatpush3.bf16.msra.mxu0 %v2738_v37 }
  0x22   :  { %2143 = vmatprep.subr.bf16.mxu0 %v2438_v26 }
  0x23   :  { %2085 = vmatmul.mubr.msk.f32.gmra.mxu0 %vm91_vm1, %v81_v51 }
  0x24   :  { %2139 = vmatprep.mubr.msk.bf16.mxu0 %vm2439_vm2, %v2438_v26 }
  0xc7   :  { %v2065_v52 = vpop.f32.mrf.mxu0 }
  0xc8   :  { %v216_v13 = vadd.f32 %v2065_v52, %v2626_v58 }
  0xc9   :  { %v210_v53 = vpop.f32.mrf.mxu0 }
  0xca   :  { %v211_v10 = vadd.f32 %v2626_v58, %v210_v53  ;;  %v306_v19 = vmul.f32 0.2, %v216_v13  ;;  %vm290_vm10 = vcmp.ge.f32.partialorder %v216_v13, 0.0 }
  0xcb   :  { %v2068_v54 = vpop.f32.mrf.mxu0 }
  0xcc   :  { %v226_v5 = vadd.f32 %v2068_v54, %v2626_v58  ;;  %v305_v17 = vmul.f32 0.2, %v211_v10  ;;  %vm289_vm9 = vcmp.ge.f32.partialorder %v211_v10, 0.0  ;;  %v322_v23 = vsel %vm290_vm10, %v216_v13, %v306_v19  ;;  %v2848_v19 = vld [vmem:[%s3215_s5 + $0x88] sm:$0xff]  }
  0xcd   :  { %v220_v55 = vpop.f32.mrf.mxu0  ;;  %vm1819_vm10 = vcmask 1024  }
  0xce   :  { %v221_v2 = vadd.f32 %v2626_v58, %v220_v55  ;;  %v308_v14 = vmul.f32 0.2, %v226_v5  ;;  %vm292_vm8 = vcmp.ge.f32.partialorder %v226_v5, 0.0  ;;  %v321_v22 = vsel %vm289_vm9, %v211_v10, %v305_v17  ;;  %v2815_v10 = vld [vmem:[%s3215_s5 + $0x98] sm:$0xff]  }
  0xcf   :  { %v2071_v56 = vpop.f32.mrf.mxu0  ;;  %v337_v24 = vpack.c.bf16 %v322_v23, %v321_v22  ;;  %v2862_v23 = vld [vmem:[%s3215_s5 + $0x80] sm:$0xff]   ;;  %vm1812_vm9 = vcmask 517120  }
  0xd0   :  { %v236_v63 = vadd.f32 %v2071_v56, %v2626_v58  ;;  %v307_v11 = vmul.f32 0.2, %v221_v2  ;;  %vm291_vm7 = vcmp.ge.f32.partialorder %v221_v2, 0.0  ;;  %v324_v20 = vsel %vm292_vm8, %v226_v5, %v308_v14 }
  0xd1   :  { %v230_v57 = vpop.f32.mrf.mxu0 }
  0xd2   :  { %v231_v60 = vadd.f32 %v2626_v58, %v230_v57  ;;  %v310_v6 = vmul.f32 0.2, %v236_v63  ;;  %vm294_vm6 = vcmp.ge.f32.partialorder %v236_v63, 0.0  ;;  %v323_v18 = vsel %vm291_vm7, %v221_v2, %v307_v11  ;;  %v2820_v11 = vld [vmem:[%s3215_s5 + $0xd8] sm:$0xff]  }
  0xd3   :  { %v2074_v59 = vpop.f32.mrf.mxu0  ;;  %v338_v21 = vpack.c.bf16 %v324_v20, %v323_v18  ;;  %v2853_v20 = vld [vmem:[%s3215_s5 + $0xc8] sm:$0xff]  }
  0xd4   :  { %v246_v61 = vadd.f32 %v2074_v59, %v2626_v58  ;;  %v309_v3 = vmul.f32 0.2, %v231_v60  ;;  %vm293_vm5 = vcmp.ge.f32.partialorder %v231_v60, 0.0  ;;  %v326_v15 = vsel %vm294_vm6, %v236_v63, %v310_v6 }
  0xd5   :  { %v240_v62 = vpop.f32.mrf.mxu0 }
  0xd6   :  { %v312_v0 = vmul.f32 0.2, %v246_v61  ;;  %v241_v1 = vadd.f32 %v2626_v58, %v240_v62  ;;  %vm296_vm3 = vcmp.ge.f32.partialorder %v246_v61, 0.0  ;;  %v325_v12 = vsel %vm293_vm5, %v231_v60, %v309_v3 }
  0xd7   :  { %v339_v16 = vpack.c.bf16 %v326_v15, %v325_v12  ;;  %v2830_v15 = vld [vmem:[%s3215_s5 + $0x90] sm:$0xff]  }
  0xd8   :  { %v311_v4 = vmul.f32 0.2, %v241_v1  ;;  %vm295_vm4 = vcmp.ge.f32.partialorder %v241_v1, 0.0  ;;  %v328_v8 = vsel %vm296_vm3, %v246_v61, %v312_v0  ;;  %v2785_v61 = vld [vmem:[%s3215_s5 + $0x18] sm:$0xff]  }
  0xda   :  { %v327_v7 = vsel %vm295_vm4, %v241_v1, %v311_v4  ;;  %v2792_v1 = vld [vmem:[%s3215_s5 + $0x10] sm:$0xff]   ;;  %v2801_v4 = vld [vmem:[%s3215_s5 + $0x8] sm:$0xff]  }
  0xdb   :  { %v340_v9 = vpack.c.bf16 %v328_v8, %v327_v7  ;;  %v2808_v7 = vld [vmem:[%s3215_s5] sm:$0xff]  }
  0xdd   :  { %2088 = vmatpush3.bf16.msra.mxu1 %v340_v9 }
  0xde   :  { %2089 = vmatprep.subr.bf16.mxu1 %v2438_v26 }
  0xe1   :  { %2090 = vmatpush3.bf16.msra.mxu1 %v339_v16  ;;  %v2835_v16 = vld [vmem:[%s3215_s5 + $0xd0] sm:$0xff]  }
  0xe2   :  { %2091 = vmatprep.subr.bf16.mxu1 %v2438_v26 }
  0xe5   :  { %2092 = vmatpush3.bf16.msra.mxu1 %v338_v21 }
  0xe6   :  { %2093 = vmatprep.subr.bf16.mxu1 %v2438_v26 }
  0xe9   :  { %2094 = vmatpush3.bf16.msra.mxu1 %v337_v24  ;;  %v2867_v24 = vld [vmem:[%s3215_s5 + $0xc0] sm:$0xff]  }
  0xea   :  { %2179 = vmatprep.subr.bf16.mxu1 %v2438_v26 }
  0xec   :  { %2096 = vmatmul.mubr.msk.bf16.vlgmr.msra.gmra.mxu1 %vm483_vm11, %v2642_v25 }
  0xed   :  { %2099 = vmatprep.mubr.msk.bf16.mxu1 %vm2439_vm2, %v2438_v26  ;;  %2180 = vmatpush3.bf16.msra.mxu1 %v2745_v38 }
  0xee   :  { %2181 = vmatprep.subr.bf16.mxu1 %v2438_v26 }
  0xf1   :  { %2182 = vmatpush3.bf16.msra.mxu1 %v2752_v39 }
  0xf2   :  { %2183 = vmatprep.subr.bf16.mxu1 %v2438_v26 }
  0xf4   :  { %2100 = vmatmul.mubr.msk.bf16.gmra.mxu1 %vm483_vm11, %v2652_v27 }
  0xf5   :  { %2103 = vmatprep.mubr.msk.bf16.mxu1 %vm2439_vm2, %v2438_v26  ;;  %2184 = vmatpush3.bf16.msra.mxu1 %v2759_v40 }
  0xf6   :  { %2185 = vmatprep.subr.bf16.mxu1 %v2438_v26 }
  0xf9   :  { %2186 = vmatpush3.bf16.msra.mxu1 %v2766_v41 }
  0xfa   :  { %2203 = vmatprep.subr.bf16.mxu1 %v2438_v26 }
  0xfc   :  { %2104 = vmatmul.mubr.msk.bf16.gmra.mxu1 %vm483_vm11, %v2661_v28 }
  0xfd   :  { %2107 = vmatprep.mubr.msk.bf16.mxu1 %vm2439_vm2, %v2438_v26 }
 0x104   :  { %2108 = vmatmul.mubr.msk.bf16.gmra.mxu1 %vm483_vm11, %v2670_v29 }
 0x105   :  { %2111 = vmatprep.mubr.msk.bf16.mxu1 %vm2439_vm2, %v2438_v26 }
 0x10c   :  { %2112 = vmatmul.mubr.msk.bf16.gmra.mxu1 %vm483_vm11, %v2679_v30 }
 0x10d   :  { %2115 = vmatprep.mubr.msk.bf16.mxu1 %vm2439_vm2, %v2438_v26 }
 0x114   :  { %2116 = vmatmul.mubr.msk.bf16.gmra.mxu1 %vm483_vm11, %v2688_v31 }
 0x115   :  { %2119 = vmatprep.mubr.msk.bf16.mxu1 %vm2439_vm2, %v2438_v26 }
 0x11c   :  { %2120 = vmatmul.mubr.msk.bf16.gmra.mxu1 %vm483_vm11, %v2697_v32 }
 0x11d   :  { %2123 = vmatprep.mubr.msk.bf16.mxu1 %vm2439_vm2, %v2438_v26 }
 0x124   :  { %2124 = vmatmul.mubr.msk.bf16.gmra.mxu1 %vm483_vm11, %v2706_v33 }
 0x125   :  { %2127 = vmatprep.mubr.msk.bf16.mxu1 %vm2439_vm2, %v2438_v26 }
 0x12c   :  { %2128 = vmatmul.mubr.msk.bf16.gmra.mxu1 %vm483_vm11, %v2715_v34 }
 0x12d   :  { %2187 = vmatprep.mubr.msk.bf16.mxu1 %vm2439_vm2, %v2438_v26 }
 0x1ac   :  { %v545_v42 = vpop.f32.mrf.mxu1 }
 0x1ae   :  { %v2097_v43 = vpop.f32.mrf.mxu1 }
 0x1b0   :  { %v548_v44 = vpop.f32.mrf.mxu1 }
 0x1b1   :  { %v616_v12 = vpack.c.bf16 %v548_v44, %v545_v42 }
 0x1b2   :  { %v2098_v45 = vpop.f32.mrf.mxu1 }
 0x1b3   :  { %v2878_v45 = vld [vmem:[%s3215_s5 + $0x38] sm:$0xff]  }
 0x1b4   :  { %v2770_v46 = vpop.f32.mrf.mxu1 }
 0x1b6   :  { %v2101_v47 = vpop.f32.mrf.mxu1 }
 0x1b8   :  { %v2772_v48 = vpop.f32.mrf.mxu1 }
 0x1b9   :  { %v617_v49 = vpack.c.bf16 %v2772_v48, %v2770_v46  ;;  %v2972_v46 = vld [vmem:[%s3215_s5 + $0x48] sm:$0xff]  }
 0x1ba   :  { %v2102_v51 = vpop.f32.mrf.mxu1 }
 0x1bc   :  { %v2776_v52 = vpop.f32.mrf.mxu1 }
 0x1be   :  { %v2105_v53 = vpop.f32.mrf.mxu1 }
 0x1bf   :  { %v2887_v53 = vld [vmem:[%s3215_s5 + $0x118] sm:$0xff]  }
 0x1c0   :  { %v2778_v54 = vpop.f32.mrf.mxu1 }
 0x1c1   :  { %v618_v55 = vpack.c.bf16 %v2778_v54, %v2776_v52  ;;  %v3014_v54 = vld [vmem:[%s3215_s5 + $0xe8] sm:$0xff]  }
 0x1c2   :  { %v2106_v56 = vpop.f32.mrf.mxu1 }
 0x1c4   :  { %v569_v57 = vpop.f32.mrf.mxu1 }
 0x1c6   :  { %v2109_v59 = vpop.f32.mrf.mxu1 }
 0x1c8   :  { %v572_v60 = vpop.f32.mrf.mxu1 }
 0x1c9   :  { %v619_v62 = vpack.c.bf16 %v572_v60, %v569_v57  ;;  %v2895_v57 = vld [vmem:[%s3215_s5 + $0x30] sm:$0xff]  }
 0x1ca   :  { %v2110_v63 = vpop.f32.mrf.mxu1  ;;  %v2904_v60 = vld [vmem:[%s3215_s5 + $0x110] sm:$0xff]  }
 0x1cb   :  { %2140 = vmatmul.mubr.msk.bf16.vlgmr.msra.gmra.mxu0 %vm483_vm11, %v619_v62  ;;  %v2913_v63 = vld [vmem:[%s3215_s5 + $0x28] sm:$0xff]  }
 0x1cc   :  { %2144 = vmatpush3.bf16.msra.mxu0 %v2785_v61  ;;  %v577_v0 = vpop.f32.mrf.mxu1  ;;  %2151 = vmatprep.mubr.msk.bf16.mxu0 %vm2439_vm2, %v2438_v26 }
 0x1cd   :  { %2145 = vmatprep.subr.bf16.mxu0 %v2438_v26 }
 0x1ce   :  { %v2113_v2 = vpop.f32.mrf.mxu1 }
 0x1d0   :  { %2146 = vmatpush3.bf16.msra.mxu0 %v2792_v1  ;;  %v580_v3 = vpop.f32.mrf.mxu1 }
 0x1d1   :  { %2147 = vmatprep.subr.bf16.mxu0 %v2438_v26  ;;  %v620_v51 = vpack.c.bf16 %v580_v3, %v577_v0  ;;  %v2915_v0 = vpop.f32.mrf.mxu0  ;;  %v2922_v3 = vld [vmem:[%s3215_s5 + $0x108] sm:$0xff]  }
 0x1d2   :  { %v2114_v5 = vpop.f32.mrf.mxu1 }
 0x1d4   :  { %2148 = vmatpush3.bf16.msra.mxu0 %v2801_v4  ;;  %v585_v6 = vpop.f32.mrf.mxu1 }
 0x1d5   :  { %2149 = vmatprep.subr.bf16.mxu0 %v2438_v26 }
 0x1d6   :  { %v2117_v8 = vpop.f32.mrf.mxu1 }
 0x1d7   :  { %v2931_v8 = vpop.f32.mrf.mxu0 }
 0x1d8   :  { %2150 = vmatpush3.bf16.msra.mxu0 %v2808_v7  ;;  %v588_v9 = vpop.f32.mrf.mxu1 }
 0x1d9   :  { %v621_v13 = vpack.c.bf16 %v588_v9, %v585_v6  ;;  %2155 = vmatprep.subr.bf16.mxu0 %v2438_v26  ;;  %v2929_v6 = vld [vmem:[%s3215_s5 + $0x20] sm:$0xff]  }
 0x1da   :  { %v2118_v14 = vpop.f32.mrf.mxu1  ;;  %v2938_v9 = vld [vmem:[%s3215_s5 + $0x100] sm:$0xff]  }
 0x1db   :  { %2152 = vmatmul.mubr.msk.bf16.vlgmr.msra.gmra.mxu0 %vm483_vm11, %v616_v12  ;;  %2188 = vmatmul.mubr.msk.bf16.vlgmr.msra.gmra.mxu1 %vm483_vm11, %v621_v13  ;;  %3222 = vst [vmem:[#allocation3_spill] sm:$0xff] %v2938_v9  ;;  %v2945_v12 = vld [vmem:[%s3215_s5 + $0x58] sm:$0xff]   ;;  %v2080_v13 = vpop.f32.mrf.mxu0 }
 0x1dc   :  { %2156 = vmatpush3.bf16.msra.mxu0 %v2815_v10  ;;  %2204 = vmatpush3.bf16.msra.mxu1 %v2820_v11  ;;  %v593_v17 = vpop.f32.mrf.mxu1 }
 0x1dd   :  { %2157 = vmatprep.subr.bf16.mxu0 %v2438_v26  ;;  %2205 = vmatprep.subr.bf16.mxu1 %v2438_v26 }
 0x1de   :  { %v2121_v18 = vpop.f32.mrf.mxu1  ;;  %2163 = vmatprep.mubr.msk.bf16.mxu0 %vm2439_vm2, %v2438_v26  ;;  %2211 = vmatprep.mubr.msk.bf16.mxu1 %vm2439_vm2, %v2438_v26 }
 0x1df   :  { %v260_v18 = vpop.f32.mrf.mxu0 }
 0x1e0   :  { %2158 = vmatpush3.bf16.msra.mxu0 %v2830_v15  ;;  %2206 = vmatpush3.bf16.msra.mxu1 %v2835_v16  ;;  %v596_v21 = vpop.f32.mrf.mxu1 }
 0x1e1   :  { %2159 = vmatprep.subr.bf16.mxu0 %v2438_v26  ;;  %2207 = vmatprep.subr.bf16.mxu1 %v2438_v26  ;;  %v622_v44 = vpack.c.bf16 %v596_v21, %v593_v17  ;;  %v2958_v17 = vld [vmem:[%s3215_s5 + $0x50] sm:$0xff]   ;;  %v2083_v48 = vpop.f32.mrf.mxu0 }
 0x1e2   :  { %v2122_v22 = vpop.f32.mrf.mxu1 }
 0x1e3   :  { %v3003_v22 = vld [vmem:[%s3215_s5 + $0xf0] sm:$0xff]  }
 0x1e4   :  { %2160 = vmatpush3.bf16.msra.mxu0 %v2848_v19  ;;  %2208 = vmatpush3.bf16.msra.mxu1 %v2853_v20  ;;  %v2869_v42 = vpop.f32.mrf.mxu1 }
 0x1e5   :  { %2161 = vmatprep.subr.bf16.mxu0 %v2438_v26  ;;  %2209 = vmatprep.subr.bf16.mxu1 %v2438_v26 }
 0x1e6   :  { %v2125_v43 = vpop.f32.mrf.mxu1 }
 0x1e8   :  { %2162 = vmatpush3.bf16.msra.mxu0 %v2862_v23  ;;  %2210 = vmatpush3.bf16.msra.mxu1 %v2867_v24  ;;  %v2880_v47 = vpop.f32.mrf.mxu1 }
 0x1e9   :  { %2167 = vmatprep.subr.bf16.mxu0 %v2438_v26  ;;  %2227 = vmatprep.subr.bf16.mxu1 %v2438_v26 }
 0x1ea   :  { %v2126_v56 = vpop.f32.mrf.mxu1 }
 0x1eb   :  { %2164 = vmatmul.mubr.msk.bf16.vlgmr.msra.gmra.mxu0 %vm483_vm11, %v620_v51  ;;  %2212 = vmatmul.mubr.msk.bf16.vlgmr.msra.gmra.mxu1 %vm483_vm11, %v622_v44  ;;  %v3023_v56 = vld [vmem:[%s3215_s5 + $0xe0] sm:$0xff]  }
 0x1ec   :  { %2168 = vmatpush3.bf16.msra.mxu0 %v2878_v45  ;;  %2175 = vmatprep.mubr.msk.bf16.mxu0 %vm2439_vm2, %v2438_v26  ;;  %v609_v59 = vpop.f32.mrf.mxu1 }
 0x1ed   :  { %2169 = vmatprep.subr.bf16.mxu0 %v2438_v26  ;;  %2228 = vmatpush3.bf16.msra.mxu1 %v2887_v53 }
 0x1ee   :  { %2229 = vmatprep.subr.bf16.mxu1 %v2438_v26  ;;  %v2129_v62 = vpop.f32.mrf.mxu1  ;;  %2235 = vmatprep.mubr.msk.bf16.mxu1 %vm2439_vm2, %v2438_v26 }
 0x1ef   :  { %v261_v62 = vadd.f32 %v2626_v58, %v260_v18 }
 0x1f0   :  { %2170 = vmatpush3.bf16.msra.mxu0 %v2895_v57  ;;  %v612_v2 = vpop.f32.mrf.mxu1 }
 0x1f1   :  { %2171 = vmatprep.subr.bf16.mxu0 %v2438_v26  ;;  %2230 = vmatpush3.bf16.msra.mxu1 %v2904_v60  ;;  %v624_v14 = vpack.c.bf16 %v612_v2, %v609_v59  ;;  %v266_v59 = vadd.f32 %v2080_v13, %v2626_v58  ;;  %v251_v13 = vadd.f32 %v2626_v58, %v2931_v8  ;;  %vm299_vm3 = vcmp.ge.f32.partialorder %v261_v62, 0.0 }
 0x1f2   :  { %2231 = vmatprep.subr.bf16.mxu1 %v2438_v26  ;;  %v2130_v5 = vpop.f32.mrf.mxu1 }
 0x1f3   :  { %vm300_vm1 = vcmp.ge.f32.partialorder %v266_v59, 0.0  ;;  %vm297_vm5 = vcmp.ge.f32.partialorder %v251_v13, 0.0 }
 0x1f4   :  { %2172 = vmatpush3.bf16.msra.mxu0 %v2913_v63 }
 0x1f5   :  { %2173 = vmatprep.subr.bf16.mxu0 %v2438_v26  ;;  %2232 = vmatpush3.bf16.msra.mxu1 %v2922_v3 }
 0x1f6   :  { %2233 = vmatprep.subr.bf16.mxu1 %v2438_v26 }
 0x1f8   :  { %2174 = vmatpush3.bf16.msra.mxu0 %v2929_v6 }
 0x1f9   :  { %2191 = vmatprep.subr.bf16.mxu0 %v2438_v26  ;;  %2234 = vmatpush3.bf16.msra.mxu1 %v2938_v9  ;;  %v315_v9 = vmul.f32 0.2, %v261_v62 }
 0x1fa   :  { %2283 = vmatprep.subr.bf16.mxu1 %v2438_v26 }
 0x1fb   :  { %2176 = vmatmul.mubr.msk.bf16.vlgmr.msra.gmra.mxu0 %vm483_vm11, %v617_v49  ;;  %v270_v49 = vpop.f32.mrf.mxu0 }
 0x1fc   :  { %2192 = vmatpush3.bf16.msra.mxu0 %v2945_v12  ;;  %2199 = vmatprep.mubr.msk.bf16.mxu0 %vm2439_vm2, %v2438_v26  ;;  %v271_v43 = vadd.f32 %v2626_v58, %v270_v49  ;;  %v623_v49 = vpack.c.bf16 %v2880_v47, %v2869_v42 }
 0x1fd   :  { %2193 = vmatprep.subr.bf16.mxu0 %v2438_v26  ;;  %2236 = vmatmul.mubr.msk.bf16.vlgmr.msra.gmra.mxu1 %vm483_vm11, %v624_v14  ;;  %v2086_v21 = vpop.f32.mrf.mxu0 }
 0x1fe   :  { %2284 = vmatpush3.bf16.msra.mxu1 %v2614_v50  ;;  %2291 = vmatprep.mubr.msk.bf16.mxu1 %vm2439_vm2, %v2438_v26  ;;  %v2981_v50 = vld [vmem:[%s3215_s5 + $0x40] sm:$0xff]   ;;  %v317_v5 = vmul.f32 0.2, %v271_v43  ;;  %vm301_vm15 = vcmp.ge.f32.partialorder %v271_v43, 0.0 }
 0x1ff   :  { %2285 = vmatprep.subr.bf16.mxu1 %v2438_v26 }
 0x200   :  { %2194 = vmatpush3.bf16.msra.mxu0 %v2958_v17 }
 0x201   :  { %2195 = vmatprep.subr.bf16.mxu0 %v2438_v26 }
 0x202   :  { %2286 = vmatpush3.bf16.msra.mxu1 %v2724_v35  ;;  %v2990_v35 = vld [vmem:[%s3215_s5 + $0xf8] sm:$0xff]  }
 0x203   :  { %2287 = vmatprep.subr.bf16.mxu1 %v2438_v26 }
 0x204   :  { %2196 = vmatpush3.bf16.msra.mxu0 %v2972_v46 }
 0x205   :  { %2197 = vmatprep.subr.bf16.mxu0 %v2438_v26 }
 0x206   :  { %2288 = vmatpush3.bf16.msra.mxu1 %v2731_v36  ;;  %v280_v36 = vpop.f32.mrf.mxu0 }
 0x207   :  { %2289 = vmatprep.subr.bf16.mxu1 %v2438_v26  ;;  %v281_v52 = vadd.f32 %v2626_v58, %v280_v36  ;;  %v316_v36 = vmul.f32 0.2, %v266_v59 }
 0x208   :  { %2198 = vmatpush3.bf16.msra.mxu0 %v2981_v50 }
 0x209   :  { %2215 = vmatprep.subr.bf16.mxu0 %v2438_v26  ;;  %v319_v51 = vmul.f32 0.2, %v281_v52  ;;  %vm303_vm13 = vcmp.ge.f32.partialorder %v281_v52, 0.0 }
 0x20a   :  { %2290 = vmatpush3.bf16.msra.mxu1 %v2738_v37  ;;  %v286_v37 = vadd.f32 %v2086_v21, %v2626_v58  ;;  %v256_v21 = vadd.f32 %v2915_v0, %v2626_v58  ;;  %v313_v0 = vmul.f32 0.2, %v251_v13 }
 0x20b   :  { %2200 = vmatmul.mubr.msk.bf16.vlgmr.msra.gmra.mxu0 %vm483_vm11, %v618_v55  ;;  %2295 = vmatprep.subr.bf16.mxu1 %v2438_v26  ;;  %v276_v55 = vadd.f32 %v2083_v48, %v2626_v58  ;;  %v335_v48 = vsel %vm303_vm13, %v281_v52, %v319_v51  ;;  %v333_v52 = vsel %vm301_vm15, %v271_v43, %v317_v5 }
 0x20c   :  { %2216 = vmatpush3.bf16.msra.mxu0 %v2990_v35  ;;  %2223 = vmatprep.mubr.msk.bf16.mxu0 %vm2439_vm2, %v2438_v26  ;;  %v320_v44 = vmul.f32 0.2, %v286_v37  ;;  %vm304_vm12 = vcmp.ge.f32.partialorder %v286_v37, 0.0  ;;  %v314_v47 = vmul.f32 0.2, %v256_v21  ;;  %v331_v58 = vsel %vm299_vm3, %v261_v62, %v315_v9 }
 0x20d   :  { %2217 = vmatprep.subr.bf16.mxu0 %v2438_v26  ;;  %v318_v2 = vmul.f32 0.2, %v276_v55  ;;  %vm302_vm14 = vcmp.ge.f32.partialorder %v276_v55, 0.0  ;;  %vm298_vm4 = vcmp.ge.f32.partialorder %v256_v21, 0.0  ;;  %v329_v43 = vsel %vm297_vm5, %v251_v13, %v313_v0 }
 0x20e   :  { %v336_v14 = vsel %vm304_vm12, %v286_v37, %v320_v44  ;;  %v332_v44 = vsel %vm300_vm1, %v266_v59, %v316_v36 }
 0x20f   :  { %v344_v18 = vpack.c.bf16 %v336_v14, %v335_v48  ;;  %v334_v37 = vsel %vm302_vm14, %v276_v55, %v318_v2  ;;  %v342_v8 = vpack.c.bf16 %v332_v44, %v331_v58  ;;  %v330_v55 = vsel %vm298_vm4, %v256_v21, %v314_v47 }
 0x210   :  { %2218 = vmatpush3.bf16.msra.mxu0 %v3003_v22  ;;  %v343_v42 = vpack.c.bf16 %v334_v37, %v333_v52  ;;  %v341_v51 = vpack.c.bf16 %v330_v55, %v329_v43 }
 0x211   :  { %2219 = vmatprep.subr.bf16.mxu0 %v2438_v26 }
 0x214   :  { %2220 = vmatpush3.bf16.msra.mxu0 %v3014_v54 }
 0x215   :  { %2221 = vmatprep.subr.bf16.mxu0 %v2438_v26 }
 0x218   :  { %2222 = vmatpush3.bf16.msra.mxu0 %v3023_v56 }
 0x219   :  { %2239 = vmatprep.subr.bf16.mxu0 %v2438_v26 }
 0x21b   :  { %2224 = vmatmul.mubr.msk.bf16.vlgmr.msra.gmra.mxu0 %vm483_vm11, %v623_v49 }
 0x21c   :  { %2240 = vmatpush3.bf16.msra.mxu0 %v344_v18  ;;  %2247 = vmatprep.mubr.msk.bf16.mxu0 %vm2439_vm2, %v2438_v26 }
 0x21d   :  { %2241 = vmatprep.subr.bf16.mxu0 %v2438_v26 }
 0x220   :  { %2242 = vmatpush3.bf16.msra.mxu0 %v343_v42 }
 0x221   :  { %2243 = vmatprep.subr.bf16.mxu0 %v2438_v26 }
 0x224   :  { %2244 = vmatpush3.bf16.msra.mxu0 %v342_v8 }
 0x225   :  { %2245 = vmatprep.subr.bf16.mxu0 %v2438_v26 }
 0x228   :  { %2246 = vmatpush3.bf16.msra.mxu0 %v341_v51 }
 0x229   :  { %2343 = vmatprep.subr.bf16.mxu0 %v2438_v26 }
 0x22b   :  { %2248 = vmatmul.mubr.msk.bf16.vlgmr.msra.gmra.mxu0 %vm483_vm11, %v2642_v25 }
 0x22c   :  { %2251 = vmatprep.mubr.msk.bf16.mxu0 %vm2439_vm2, %v2438_v26  ;;  %2344 = vmatpush3.bf16.msra.mxu0 %v2945_v12 }
 0x22d   :  { %2345 = vmatprep.subr.bf16.mxu0 %v2438_v26 }
 0x230   :  { %2346 = vmatpush3.bf16.msra.mxu0 %v2958_v17 }
 0x231   :  { %2347 = vmatprep.subr.bf16.mxu0 %v2438_v26 }
 0x233   :  { %2252 = vmatmul.mubr.msk.bf16.gmra.mxu0 %vm483_vm11, %v2652_v27 }
 0x234   :  { %2255 = vmatprep.mubr.msk.bf16.mxu0 %vm2439_vm2, %v2438_v26  ;;  %2348 = vmatpush3.bf16.msra.mxu0 %v2972_v46 }
 0x235   :  { %2349 = vmatprep.subr.bf16.mxu0 %v2438_v26 }
 0x238   :  { %2350 = vmatpush3.bf16.msra.mxu0 %v2981_v50 }
 0x239   :  { %2367 = vmatprep.subr.bf16.mxu0 %v2438_v26 }
 0x23b   :  { %2256 = vmatmul.mubr.msk.bf16.gmra.mxu0 %vm483_vm11, %v2661_v28 }
 0x23c   :  { %2259 = vmatprep.mubr.msk.bf16.mxu0 %vm2439_vm2, %v2438_v26 }
 0x243   :  { %2260 = vmatmul.mubr.msk.bf16.gmra.mxu0 %vm483_vm11, %v2670_v29 }
 0x244   :  { %2263 = vmatprep.mubr.msk.bf16.mxu0 %vm2439_vm2, %v2438_v26 }
 0x24b   :  { %2264 = vmatmul.mubr.msk.bf16.gmra.mxu0 %vm483_vm11, %v2679_v30 }
 0x24c   :  { %2267 = vmatprep.mubr.msk.bf16.mxu0 %vm2439_vm2, %v2438_v26 }
 0x253   :  { %2268 = vmatmul.mubr.msk.bf16.gmra.mxu0 %vm483_vm11, %v2688_v31 }
 0x254   :  { %2271 = vmatprep.mubr.msk.bf16.mxu0 %vm2439_vm2, %v2438_v26 }
 0x25b   :  { %2272 = vmatmul.mubr.msk.bf16.gmra.mxu0 %vm483_vm11, %v2697_v32 }
 0x25c   :  { %2275 = vmatprep.mubr.msk.bf16.mxu0 %vm2439_vm2, %v2438_v26 }
 0x263   :  { %2276 = vmatmul.mubr.msk.bf16.gmra.mxu0 %vm483_vm11, %v2706_v33 }
 0x264   :  { %2279 = vmatprep.mubr.msk.bf16.mxu0 %vm2439_vm2, %v2438_v26 }
 0x26b   :  { %2280 = vmatmul.mubr.msk.bf16.gmra.mxu0 %vm483_vm11, %v2715_v34 }
 0x26c   :  { %2351 = vmatprep.mubr.msk.bf16.mxu0 %vm2439_vm2, %v2438_v26 }
 0x28b   :  { %v686_v25 = vpop.f32.mrf.mxu0 }
 0x28d   :  { %v2141_v27 = vpop.f32.mrf.mxu0 }
 0x28f   :  { %v689_v28 = vpop.f32.mrf.mxu0 }
 0x291   :  { %v2142_v29 = vpop.f32.mrf.mxu0 }
 0x29b   :  { %v754_v30 = vpop.f32.mrf.mxu0  ;;  %v958_v31 = vpop.f32.mrf.mxu1 }
 0x29c   :  { %v755_v32 = vadd.f32 %v754_v30, %v686_v25 }
 0x29d   :  { %v2153_v9 = vpop.f32.mrf.mxu0  ;;  %v2189_v12 = vpop.f32.mrf.mxu1 }
 0x29f   :  { %v757_v17 = vpop.f32.mrf.mxu0  ;;  %v961_v33 = vpop.f32.mrf.mxu1 }
 0x2a0   :  { %v758_v46 = vadd.f32 %v757_v17, %v689_v28 }
 0x2a1   :  { %v2154_v50 = vpop.f32.mrf.mxu0  ;;  %v2190_v59 = vpop.f32.mrf.mxu1 }
 0x2a2   :  { %v3090_v50 = vld [vmem:[%s3217_s6] ss:$0 sm:$0xff] }
 0x2ab   :  { %v822_v62 = vpop.f32.mrf.mxu0  ;;  %v1094_v2 = vpop.f32.mrf.mxu1 }
 0x2ac   :  { %v1101_v34 = vadd.f32 %v1094_v2, %v755_v32 }
 0x2ad   :  { %v2165_v5 = vpop.f32.mrf.mxu0  ;;  %v2213_v14 = vpop.f32.mrf.mxu1 }
 0x2af   :  { %v825_v48 = vpop.f32.mrf.mxu0  ;;  %v1097_v49 = vpop.f32.mrf.mxu1 }
 0x2b0   :  { %v1102_v21 = vadd.f32 %v1097_v49, %v758_v46 }
 0x2b1   :  { %v2166_v13 = vpop.f32.mrf.mxu0  ;;  %v2214_v18 = vpop.f32.mrf.mxu1 }
 0x2bb   :  { %v890_v36 = vpop.f32.mrf.mxu0 }
 0x2bc   :  { %v891_v37 = vadd.f32 %v890_v36, %v822_v62  ;;  %v3102_v36 = vld [vmem:[%s3218_s7 + $0x8] sm:$0xff] }
 0x2bd   :  { %v2177_v52 = vpop.f32.mrf.mxu0  ;;  %v1234_v42 = vpop.f32.mrf.mxu1 }
 0x2bf   :  { %v893_v47 = vpop.f32.mrf.mxu0  ;;  %v2237_v0 = vpop.f32.mrf.mxu1 }
 0x2c0   :  { %v894_v44 = vadd.f32 %v893_v47, %v825_v48 }
 0x2c1   :  { %v2178_v58 = vpop.f32.mrf.mxu0  ;;  %v1237_v8 = vpop.f32.mrf.mxu1 }
 0x2c3   :  { %v2238_v55 = vpop.f32.mrf.mxu1 }
 0x2cb   :  { %v1026_v43 = vpop.f32.mrf.mxu0 }
 0x2cc   :  { %v1027_v51 = vadd.f32 %v1026_v43, %v958_v31 }
 0x2cd   :  { %v2201_v25 = vpop.f32.mrf.mxu0 }
 0x2ce   :  { %v1241_v27 = vadd.f32 %v1234_v42, %v1027_v51 }
 0x2cf   :  { %v1029_v28 = vpop.f32.mrf.mxu0 }
 0x2d0   :  { %v1030_v29 = vadd.f32 %v1029_v28, %v961_v33 }
 0x2d1   :  { %v2202_v30 = vpop.f32.mrf.mxu0 }
 0x2d2   :  { %v1242_v32 = vadd.f32 %v1237_v8, %v1030_v29 }
 0x2db   :  { %v1164_v9 = vpop.f32.mrf.mxu0 }
 0x2dc   :  { %v1171_v12 = vadd.f32 %v1164_v9, %v891_v37 }
 0x2dd   :  { %v2225_v17 = vpop.f32.mrf.mxu0 }
 0x2de   :  { %v1243_v46 = vadd.f32 %v1171_v12, %v1101_v34  ;;  %v3097_v34 = vld [vmem:[%s3218_s7] sm:$0xff] }
 0x2df   :  { %v1167_v59 = vpop.f32.mrf.mxu0 }
 0x2e0   :  { %v1245_v62 = vadd.f32 %v1243_v46, %v1241_v27  ;;  %v1172_v2 = vadd.f32 %v1167_v59, %v894_v44 }
 0x2e1   :  { %v2226_v5 = vpop.f32.mrf.mxu0 }
 0x2e2   :  { %v1253_v31 = vadd.f32 %v3090_v50, %v1245_v62  ;;  %v1244_v14 = vadd.f32 %v1172_v2, %v1102_v21 }
 0x2e4   :  { %vm1255_vm6 = vcmp.ge.f32.partialorder %v1253_v31, 0.0  ;;  %v1257_v33 = vmul.f32 0.2, %v1253_v31  ;;  %v1246_v48 = vadd.f32 %v1244_v14, %v1242_v32 }
 0x2e6   :  { %v1259_v49 = vsel %vm1255_vm6, %v1253_v31, %v1257_v33  ;;  %v1254_v13 = vadd.f32 %v3090_v50, %v1246_v48 }
 0x2e7   :  { %v1261_v21 = vmul.f32 %v1259_v49, %v3097_v34 }
 0x2e8   :  { %vm1256_vm7 = vcmp.ge.f32.partialorder %v1254_v13, 0.0  ;;  %v1258_v18 = vmul.f32 0.2, %v1254_v13 }
 0x2e9   :  { %v1263_v0 = vsel %vm483_vm11, %v1261_v21, 0.0 }
 0x2ea   :  { %v1260_v37 = vsel %vm1256_vm7, %v1254_v13, %v1258_v18 }
 0x2eb   :  { %v1306_v52 = vpop.f32.mrf.mxu0  ;;  %v1262_v42 = vmul.f32 %v1260_v37, %v3102_v36 }
 0x2ed   :  { %v2249_v47 = vpop.f32.mrf.mxu0  ;;  %v1264_v44 = vsel %vm483_vm11, %v1262_v42, 0.0 }
 0x2ee   :  { %v3108_v58 = vadd.f32 %v1264_v44, %v1263_v0 }
 0x2ef   :  { %v1309_v8 = vpop.f32.mrf.mxu0 }
 0x2f0   :  { %v1377_v33 = vpack.c.bf16 %v1309_v8, %v1306_v52 }
 0x2f1   :  { %v2250_v55 = vpop.f32.mrf.mxu0 }
 0x2f3   :  { %v3110_v43 = vpop.f32.mrf.mxu0 }
 0x2f5   :  { %v2253_v51 = vpop.f32.mrf.mxu0 }
 0x2f7   :  { %v3112_v25 = vpop.f32.mrf.mxu0 }
 0x2f8   :  { %v1378_v27 = vpack.c.bf16 %v3112_v25, %v3110_v43 }
 0x2f9   :  { %v2254_v28 = vpop.f32.mrf.mxu0 }
 0x2fb   :  { %v1322_v29 = vpop.f32.mrf.mxu0 }
 0x2fd   :  { %v2257_v30 = vpop.f32.mrf.mxu0 }
 0x2ff   :  { %v1325_v32 = vpop.f32.mrf.mxu0 }
 0x300   :  { %v1379_v9 = vpack.c.bf16 %v1325_v32, %v1322_v29 }
 0x301   :  { %v2258_v12 = vpop.f32.mrf.mxu0 }
 0x302   :  { %2352 = vmatmul.mubr.msk.bf16.vlgmr.msra.gmra.mxu0 %vm483_vm11, %v1379_v9 }
 0x303   :  { %v1330_v17 = vpop.f32.mrf.mxu0  ;;  %2368 = vmatpush3.bf16.msra.mxu0 %v2990_v35  ;;  %2375 = vmatprep.mubr.msk.bf16.mxu0 %vm2439_vm2, %v2438_v26 }
 0x304   :  { %2369 = vmatprep.subr.bf16.mxu0 %v2438_v26 }
 0x305   :  { %v2261_v46 = vpop.f32.mrf.mxu0 }
 0x307   :  { %v1333_v59 = vpop.f32.mrf.mxu0  ;;  %2370 = vmatpush3.bf16.msra.mxu0 %v3003_v22 }
 0x308   :  { %v1380_v62 = vpack.c.bf16 %v1333_v59, %v1330_v17  ;;  %2371 = vmatprep.subr.bf16.mxu0 %v2438_v26 }
 0x309   :  { %v2262_v2 = vpop.f32.mrf.mxu0 }
 0x30a   :  { %2292 = vmatmul.mubr.msk.bf16.vlgmr.msra.gmra.mxu1 %vm483_vm11, %v1380_v62 }
 0x30b   :  { %2296 = vmatpush3.bf16.msra.mxu1 %v2785_v61  ;;  %2303 = vmatprep.mubr.msk.bf16.mxu1 %vm2439_vm2, %v2438_v26  ;;  %v1338_v35 = vpop.f32.mrf.mxu0 }
 0x30c   :  { %2297 = vmatprep.subr.bf16.mxu1 %v2438_v26  ;;  %2372 = vmatpush3.bf16.msra.mxu0 %v3014_v54 }
 0x30d   :  { %v2265_v5 = vpop.f32.mrf.mxu0  ;;  %2373 = vmatprep.subr.bf16.mxu0 %v2438_v26 }
 0x30f   :  { %2298 = vmatpush3.bf16.msra.mxu1 %v2792_v1  ;;  %v1341_v22 = vpop.f32.mrf.mxu0 }
 0x310   :  { %2299 = vmatprep.subr.bf16.mxu1 %v2438_v26  ;;  %2374 = vmatpush3.bf16.msra.mxu0 %v3023_v56  ;;  %v1381_v18 = vpack.c.bf16 %v1341_v22, %v1338_v35 }
 0x311   :  { %v2266_v31 = vpop.f32.mrf.mxu0 }
 0x313   :  { %2300 = vmatpush3.bf16.msra.mxu1 %v2801_v4  ;;  %v1346_v61 = vpop.f32.mrf.mxu0 }
 0x314   :  { %2301 = vmatprep.subr.bf16.mxu1 %v2438_v26 }
 0x315   :  { %v2269_v14 = vpop.f32.mrf.mxu0 }
 0x317   :  { %2302 = vmatpush3.bf16.msra.mxu1 %v2808_v7  ;;  %v1349_v54 = vpop.f32.mrf.mxu0 }
 0x318   :  { %2307 = vmatprep.subr.bf16.mxu1 %v2438_v26 }
 0x319   :  { %v2270_v48 = vpop.f32.mrf.mxu0 }
 0x31a   :  { %2304 = vmatmul.mubr.msk.bf16.vlgmr.msra.gmra.mxu1 %vm483_vm11, %v1377_v33 }
 0x31b   :  { %2308 = vmatpush3.bf16.msra.mxu1 %v2815_v10  ;;  %2315 = vmatprep.mubr.msk.bf16.mxu1 %vm2439_vm2, %v2438_v26  ;;  %v1354_v1 = vpop.f32.mrf.mxu0 }
 0x31c   :  { %2309 = vmatprep.subr.bf16.mxu1 %v2438_v26 }
 0x31d   :  { %v2273_v4 = vpop.f32.mrf.mxu0 }
 0x31f   :  { %2310 = vmatpush3.bf16.msra.mxu1 %v2830_v15  ;;  %v1357_v56 = vpop.f32.mrf.mxu0 }
 0x320   :  { %2311 = vmatprep.subr.bf16.mxu1 %v2438_v26 }
 0x321   :  { %v2274_v7 = vpop.f32.mrf.mxu0 }
 0x323   :  { %2312 = vmatpush3.bf16.msra.mxu1 %v2848_v19  ;;  %v1362_v49 = vpop.f32.mrf.mxu0 }
 0x324   :  { %2313 = vmatprep.subr.bf16.mxu1 %v2438_v26 }
 0x325   :  { %v2277_v13 = vpop.f32.mrf.mxu0 }
 0x327   :  { %2314 = vmatpush3.bf16.msra.mxu1 %v2862_v23  ;;  %v1365_v10 = vpop.f32.mrf.mxu0 }
 0x328   :  { %2319 = vmatprep.subr.bf16.mxu1 %v2438_v26  ;;  %v1384_v21 = vpack.c.bf16 %v1365_v10, %v1362_v49 }
 0x329   :  { %v2278_v37 = vpop.f32.mrf.mxu0 }
 0x32a   :  { %2316 = vmatmul.mubr.msk.bf16.vlgmr.msra.gmra.mxu1 %vm483_vm11, %v1381_v18  ;;  %2376 = vmatmul.mubr.msk.bf16.vlgmr.msra.gmra.mxu0 %vm483_vm11, %v1384_v21 }
 0x32b   :  { %2320 = vmatpush3.bf16.msra.mxu1 %v2878_v45  ;;  %2327 = vmatprep.mubr.msk.bf16.mxu1 %vm2439_vm2, %v2438_v26  ;;  %v1370_v15 = vpop.f32.mrf.mxu0  ;;  %v1382_v45 = vpack.c.bf16 %v1349_v54, %v1346_v61 }
 0x32c   :  { %2321 = vmatprep.subr.bf16.mxu1 %v2438_v26 }
 0x32d   :  { %v2281_v19 = vpop.f32.mrf.mxu0 }
 0x32f   :  { %2322 = vmatpush3.bf16.msra.mxu1 %v2895_v57  ;;  %v1373_v23 = vpop.f32.mrf.mxu0 }
 0x330   :  { %2323 = vmatprep.subr.bf16.mxu1 %v2438_v26 }
 0x331   :  { %v2282_v52 = vpop.f32.mrf.mxu0 }
 0x333   :  { %2324 = vmatpush3.bf16.msra.mxu1 %v2913_v63 }
 0x334   :  { %2325 = vmatprep.subr.bf16.mxu1 %v2438_v26 }
 0x337   :  { %2326 = vmatpush3.bf16.msra.mxu1 %v2929_v6 }
 0x338   :  { %2331 = vmatprep.subr.bf16.mxu1 %v2438_v26 }
 0x33a   :  { %2328 = vmatmul.mubr.msk.bf16.vlgmr.msra.gmra.mxu1 %vm483_vm11, %v1378_v27 }
 0x33b   :  { %2332 = vmatpush3.bf16.msra.mxu1 %v2745_v38  ;;  %2339 = vmatprep.mubr.msk.bf16.mxu1 %vm2439_vm2, %v2438_v26  ;;  %v1383_v38 = vpack.c.bf16 %v1357_v56, %v1354_v1 }
 0x33c   :  { %2333 = vmatprep.subr.bf16.mxu1 %v2438_v26 }
 0x33f   :  { %2334 = vmatpush3.bf16.msra.mxu1 %v2752_v39  ;;  %v3223_v39 = vld [vmem:[#allocation3_spill] sm:$0xff] }
 0x340   :  { %2335 = vmatprep.subr.bf16.mxu1 %v2438_v26 }
 0x343   :  { %2336 = vmatpush3.bf16.msra.mxu1 %v2759_v40  ;;  %v1385_v40 = vpack.c.bf16 %v1373_v23, %v1370_v15 }
 0x344   :  { %2337 = vmatprep.subr.bf16.mxu1 %v2438_v26 }
 0x347   :  { %2338 = vmatpush3.bf16.msra.mxu1 %v2766_v41 }
 0x348   :  { %2355 = vmatprep.subr.bf16.mxu1 %v2438_v26 }
 0x34a   :  { %2340 = vmatmul.mubr.msk.bf16.vlgmr.msra.gmra.mxu1 %vm483_vm11, %v1382_v45  ;;  %v1266_v45 = vrot.slane %v3108_v58, 4 }
 0x34b   :  { %2356 = vmatpush3.bf16.msra.mxu1 %v2820_v11  ;;  %2363 = vmatprep.mubr.msk.bf16.mxu1 %vm2439_vm2, %v2438_v26 }
 0x34c   :  { %2357 = vmatprep.subr.bf16.mxu1 %v2438_v26 }
 0x34f   :  { %2358 = vmatpush3.bf16.msra.mxu1 %v2835_v16 }
 0x350   :  { %2359 = vmatprep.subr.bf16.mxu1 %v2438_v26 }
 0x353   :  { %2360 = vmatpush3.bf16.msra.mxu1 %v2853_v20 }
 0x354   :  { %2361 = vmatprep.subr.bf16.mxu1 %v2438_v26 }
 0x357   :  { %2362 = vmatpush3.bf16.msra.mxu1 %v2867_v24 }
 0x358   :  { %2379 = vmatprep.subr.bf16.mxu1 %v2438_v26 }
 0x35a   :  { %2364 = vmatmul.mubr.msk.bf16.vlgmr.msra.gmra.mxu1 %vm483_vm11, %v1383_v38 }
 0x35b   :  { %2380 = vmatpush3.bf16.msra.mxu1 %v2887_v53  ;;  %2387 = vmatprep.mubr.msk.bf16.mxu1 %vm2439_vm2, %v2438_v26 }
 0x35c   :  { %2381 = vmatprep.subr.bf16.mxu1 %v2438_v26 }
 0x35f   :  { %2382 = vmatpush3.bf16.msra.mxu1 %v2904_v60 }
 0x360   :  { %2383 = vmatprep.subr.bf16.mxu1 %v2438_v26 }
 0x363   :  { %2384 = vmatpush3.bf16.msra.mxu1 %v2922_v3 }
 0x364   :  { %2385 = vmatprep.subr.bf16.mxu1 %v2438_v26 }
 0x367   :  { %2386 = vmatpush3.bf16.msra.mxu1 %v3223_v39 }
 0x36a   :  { %2388 = vmatmul.mubr.msk.bf16.vlgmr.msra.gmra.mxu1 %vm483_vm11, %v1385_v40 }
 0x3c2   :  { %v1643_v41 = vpop.f32.mrf.mxu0 }
 0x3c4   :  { %v2353_v11 = vpop.f32.mrf.mxu0 }
 0x3c6   :  { %v1646_v16 = vpop.f32.mrf.mxu0 }
 0x3c8   :  { %v2354_v20 = vpop.f32.mrf.mxu0 }
 0x3ca   :  { %v1423_v24 = vpop.f32.mrf.mxu1 }
 0x3cc   :  { %v2293_v53 = vpop.f32.mrf.mxu1 }
 0x3ce   :  { %v1426_v57 = vpop.f32.mrf.mxu1 }
 0x3d0   :  { %v2294_v63 = vpop.f32.mrf.mxu1 }
 0x3da   :  { %v1467_v60 = vpop.f32.mrf.mxu1 }
 0x3db   :  { %v1468_v6 = vadd.f32 %v1467_v60, %v1423_v24 }
 0x3dc   :  { %v2305_v42 = vpop.f32.mrf.mxu1 }
 0x3de   :  { %v1470_v47 = vpop.f32.mrf.mxu1 }
 0x3df   :  { %v1471_v3 = vadd.f32 %v1470_v47, %v1426_v57 }
 0x3e0   :  { %v2306_v0 = vpop.f32.mrf.mxu1 }
 0x3ea   :  { %v1511_v26 = vpop.f32.mrf.mxu1  ;;  %v1733_v44 = vpop.f32.mrf.mxu0 }
 0x3ec   :  { %v2317_v8 = vpop.f32.mrf.mxu1  ;;  %v2377_v55 = vpop.f32.mrf.mxu0 }
 0x3ee   :  { %v1514_v43 = vpop.f32.mrf.mxu1  ;;  %v1736_v51 = vpop.f32.mrf.mxu0 }
 0x3f0   :  { %v2318_v25 = vpop.f32.mrf.mxu1  ;;  %v2378_v27 = vpop.f32.mrf.mxu0 }
 0x3fa   :  { %v1555_v28 = vpop.f32.mrf.mxu1 }
 0x3fb   :  { %v1556_v29 = vadd.f32 %v1555_v28, %v1511_v26 }
 0x3fc   :  { %v2329_v30 = vpop.f32.mrf.mxu1 }
 0x3fd   :  { %v1740_v32 = vadd.f32 %v1733_v44, %v1556_v29 }
 0x3fe   :  { %v1558_v9 = vpop.f32.mrf.mxu1 }
 0x3ff   :  { %v1559_v14 = vadd.f32 %v1558_v9, %v1514_v43 }
 0x400   :  { %v2330_v12 = vpop.f32.mrf.mxu1 }
 0x401   :  { %v1741_v56 = vadd.f32 %v1736_v51, %v1559_v14 }
 0x40a   :  { %v1599_v17 = vpop.f32.mrf.mxu1 }
 0x40b   :  { %v1644_v54 = vadd.f32 %v1643_v41, %v1599_v17  ;;  %v1267_v41 = vadd.f32 %v1266_v45, %v3108_v58 }
 0x40c   :  { %v2341_v46 = vpop.f32.mrf.mxu1 }
 0x40d   :  { %v1268_v24 = vrot.slane %v1267_v41, 2 }
 0x40e   :  { %v1602_v59 = vpop.f32.mrf.mxu1 }
 0x40f   :  { %v1647_v7 = vadd.f32 %v1646_v16, %v1602_v59  ;;  %v1269_v63 = vadd.f32 %v1268_v24, %v1267_v41 }
 0x410   :  { %v2342_v62 = vpop.f32.mrf.mxu1 }
 0x41a   :  { %v1687_v2 = vpop.f32.mrf.mxu1 }
 0x41b   :  { %v1694_v35 = vadd.f32 %v1687_v2, %v1468_v6  ;;  %v1270_v6 = vrot.slane %v1269_v63, 1 }
 0x41c   :  { %v2365_v5 = vpop.f32.mrf.mxu1 }
 0x41d   :  { %v1788_v22 = vadd.f32 %v1740_v32, %v1694_v35 }
 0x41e   :  { %v1690_v31 = vpop.f32.mrf.mxu1 }
 0x41f   :  { %v1695_v48 = vadd.f32 %v1690_v31, %v1471_v3  ;;  %v1271_v3 = vadd.f32 %v1270_v6, %v1269_v63 }
 0x420   :  { %v2366_v61 = vpop.f32.mrf.mxu1 }
 0x421   :  { %v1789_v10 = vadd.f32 %v1741_v56, %v1695_v48 }
 0x42a   :  { %v1779_v33 = vpop.f32.mrf.mxu1 }
 0x42b   :  { %v1786_v1 = vadd.f32 %v1779_v33, %v1644_v54 }
 0x42c   :  { %v2389_v4 = vpop.f32.mrf.mxu1 }
 0x42d   :  { %v1790_v49 = vadd.f32 %v1788_v22, %v1786_v1 }
 0x42e   :  { %v1782_v13 = vpop.f32.mrf.mxu1 }
 0x42f   :  { %v1792_v18 = vadd.f32 %v3090_v50, %v1790_v49  ;;  %v1787_v21 = vadd.f32 %v1782_v13, %v1647_v7 }
 0x430   :  { %v2390_v37 = vpop.f32.mrf.mxu1 }
 0x431   :  { %vm1794_vm2 = vcmp.ge.f32.partialorder %v1792_v18, 0.0  ;;  %v1796_v15 = vmul.f32 0.2, %v1792_v18  ;;  %v1791_v19 = vadd.f32 %v1789_v10, %v1787_v21 }
 0x433   :  { %v1798_v23 = vsel %vm1794_vm2, %v1792_v18, %v1796_v15  ;;  %v1793_v52 = vadd.f32 %v3090_v50, %v1791_v19 }
 0x434   :  { %v1800_v39 = vmul.f32 %v1798_v23, %v3097_v34 }
 0x435   :  { %vm1795_vm8 = vcmp.ge.f32.partialorder %v1793_v52, 0.0  ;;  %v1797_v38 = vmul.f32 0.2, %v1793_v52 }
 0x436   :  { %v1802_v16 = vsel %vm483_vm11, %v1800_v39, 0.0 }
 0x437   :  { %v1799_v40 = vsel %vm1795_vm8, %v1793_v52, %v1797_v38 }
 0x438   :  { %v1801_v11 = vmul.f32 %v1799_v40, %v3102_v36  ;;  %v1817_v36 = vstv %s3219_s8 }
 0x43a   :  { %v1803_v20 = vsel %vm483_vm11, %v1801_v11, 0.0 }
 0x43b   :  { %v1804_v53 = vadd.f32 %v1803_v20, %v1802_v16 }
 0x43d   :  { %v1805_v57 = vrot.slane %v1804_v53, 4 }
 0x43f   :  { %v1806_v50 = vadd.f32 %v1805_v57, %v1804_v53 }
 0x441   :  { %v1807_v60 = vrot.slane %v1806_v50, 2 }
 0x443   :  { %v1808_v42 = vadd.f32 %v1807_v60, %v1806_v50 }
 0x445   :  { %v1809_v47 = vrot.slane %v1808_v42, 1 }
 0x447   :  { %v1810_v34 = vadd.f32 %v1809_v47, %v1808_v42 }
 0x449   :  { %v1811_v58 = vsel %vm140_vm0, %v1271_v3, %v1810_v34 }
 0x44a   :  { %v1813_v0 = vsel %vm1812_vm9, %v1811_v58, 0.0 }
 0x44b   :  { %1814 = vadd.xlane.f32.xlu0 %v1813_v0 }
 0x4d4   :  { %v1815_v26 = vpop.xlane.xlu0 %1814 }
 0x4d5   :  { %v1818_v44 = vadd.f32 %v1817_v36, %v1815_v26 }
 0x4d7   :  { %1820 = vst.msk [vmem:[%s3220_s9] sm:$0x3] %vm1819_vm10, %v1818_v44 }

</bundles_post_ra>
